<compile_context>
chip_gen: v5e
topology: v5e:2x2
jax: 0.10.0
libtpu: 0.0.40
codegen_flags: <defaults>
</compile_context>

<pallas_src>
import functools

import jax
import jax.numpy as jnp
import numpy as np
from jax import lax
from jax.experimental import pallas as pl
from jax.experimental.pallas import tpu as pltpu

_NEG = -1e30  # finite "minus infinity": avoids inf-inf NaNs in online updates


def _chexzero_kernel(scale_ref, img_ref, lab_row_ref, lab_col_ref, txt_hbm_ref,
                     loss_ref,
                     txt_vmem, col_m, col_l, row_m, row_l,
                     img_acc, txt_sel_acc, copy_sem,
                     *, row_tile, col_tile, n_chunks, n_valid):
    i = pl.program_id(0)
    n_tiles = pl.num_programs(0)

    @pl.when(i == 0)
    def _init():
        # One-shot DMA of the (padded, chunk-major) text matrix into VMEM:
        # guaranteed single-buffered resident copy.
        cp = pltpu.make_async_copy(txt_hbm_ref, txt_vmem, copy_sem)
        cp.start()
        cp.wait()
        col_m[...] = jnp.full_like(col_m, _NEG)
        col_l[...] = jnp.zeros_like(col_l)
        img_acc[...] = jnp.zeros_like(img_acc)
        txt_sel_acc[...] = jnp.zeros_like(txt_sel_acc)

    scale = jnp.exp(scale_ref[0, 0])

    img = img_ref[...]            # (row_tile, D) in the *input* dtype (bf16-friendly)
    lab_row = lab_row_ref[...]    # (row_tile, 1) int32, -1 on padded rows

    # Per-row-tile online softmax state (accumulated over column chunks).
    row_m[...] = jnp.full_like(row_m, _NEG)
    row_l[...] = jnp.zeros_like(row_l)

    row_base = i * row_tile
    row_ids = lax.broadcasted_iota(jnp.int32, (row_tile, col_tile), 0) + row_base
    row_valid = (lax.broadcasted_iota(jnp.int32, (row_tile, 1), 0) + row_base) < n_valid

    def chunk_body(c):
        col_base = c * col_tile
        txt_chunk = txt_vmem[c]                       # (col_tile, D), input dtype
        lab_col = lab_col_ref[c]                      # (1, col_tile) int32

        # One NT matmul on the MXU in the input dtype; f32 accumulation.  The
        # scale multiplies the f32 logits so the operands are never promoted.
        logits = lax.dot_general(
            img, txt_chunk, (((1,), (1,)), ((), ())),
            preferred_element_type=jnp.float32) * scale      # (row_tile, col_tile)

        col_ids = lax.broadcasted_iota(jnp.int32, (row_tile, col_tile), 1) + col_base
        col_valid = col_ids[:1, :] < n_valid                  # (1, col_tile)

        # ---- image loss: row-wise online LSE (padded columns masked out) ----
        lr = jnp.where(col_valid, logits, _NEG)
        new_rm = jnp.maximum(row_m[...], jnp.max(lr, axis=1, keepdims=True))
        row_l[...] = (row_l[...] * jnp.exp(row_m[...] - new_rm)
                      + jnp.sum(jnp.exp(lr - new_rm), axis=1, keepdims=True))
        row_m[...] = new_rm

        # ---- text loss: column-wise online LSE across row tiles (padded rows masked) ----
        lc = jnp.where(row_valid, logits, _NEG)
        old_cm = col_m[c]
        new_cm = jnp.maximum(old_cm, jnp.max(lc, axis=0, keepdims=True))
        col_l[c] = (col_l[c] * jnp.exp(old_cm - new_cm)
                    + jnp.sum(jnp.exp(lc - new_cm), axis=0, keepdims=True))
        col_m[c] = new_cm

        # ---- label picks (padded labels are -1 -> never match) ----
        img_acc[...] -= jnp.sum(jnp.where(col_ids == lab_row, logits, 0.0))
        txt_sel_acc[...] += jnp.sum(jnp.where(row_ids == lab_col, logits, 0.0))

    if n_chunks == 1:
        chunk_body(0)
    else:
        @pl.loop(0, n_chunks)
        def _chunks(c):
            chunk_body(c)

    # Close out the image-CE contribution of this row tile (real rows only).
    row_lse = row_m[...] + jnp.log(row_l[...])                 # (row_tile, 1)
    img_acc[...] += jnp.sum(jnp.where(row_valid, row_lse, 0.0))

    @pl.when(i == n_tiles - 1)
    def _finalize():
        col_lse = col_m[...] + jnp.log(col_l[...])             # (n_chunks, 1, col_tile)
        gcol = (lax.broadcasted_iota(jnp.int32, col_lse.shape, 0) * col_tile
                + lax.broadcasted_iota(jnp.int32, col_lse.shape, 2))
        txt_lse_sum = jnp.sum(jnp.where(gcol < n_valid, col_lse, 0.0))
        inv_n = 1.0 / float(n_valid)
        loss_img = img_acc[...] * inv_n                        # (1, 1)
        loss_txt = (txt_lse_sum - txt_sel_acc[...]) * inv_n    # (1, 1)
        loss_ref[...] = 0.5 * (loss_img + loss_txt)


def _pick_tiles(np_):
    row_tile = 256 if np_ % 256 == 0 else 128
    if np_ % 512 == 0:
        col_tile = 512
    elif np_ % 256 == 0:
        col_tile = 256
    else:
        col_tile = 128
    return min(row_tile, np_), min(col_tile, np_)


def chexzero_loss(log_scale, image_features, text_features, labels):
    """Pallas implementation of chexzeroLoss.forward(..., mode='train') with
    criterion = nn.CrossEntropyLoss() (mean reduction, class-index labels)."""
    N, D = image_features.shape
    assert text_features.shape == (N, D) and labels.shape == (N,)

    # Pad the batch to a multiple of 128 (MXU / lane alignment); padded rows,
    # columns and labels(-1) are masked out inside the kernel.
    Np = ((N + 127) // 128) * 128
    row_tile, col_tile = _pick_tiles(Np)
    n_tiles = Np // row_tile
    n_chunks = Np // col_tile
    assert n_tiles * row_tile == Np and n_chunks * col_tile == Np

    pad = Np - N
    img_p = jnp.pad(image_features, ((0, pad), (0, 0)))
    txt_p = jnp.pad(text_features, ((0, pad), (0, 0)))
    lab_p = jnp.pad(labels.astype(jnp.int32), (0, pad), constant_values=-1)

    lab_row = lab_p.reshape(Np, 1)
    lab_col = lab_p.reshape(n_chunks, 1, col_tile)
    txt_chunks = txt_p.reshape(n_chunks, col_tile, D)   # chunk-major resident text
    ls = jnp.asarray(log_scale, jnp.float32).reshape(1, 1)

    img_isz = image_features.dtype.itemsize
    txt_isz = text_features.dtype.itemsize

    # VMEM budget: resident text + double-buffered image tile + online-softmax
    # scratch + a handful of (row_tile, col_tile) f32 slabs, with headroom.
    slab = row_tile * col_tile * 4
    vmem_needed = (Np * D * txt_isz
                   + 2 * row_tile * D * img_isz
                   + 2 * n_chunks * 8 * col_tile * 4
                   + 2 * row_tile * 128 * 4
                   + 8 * slab)
    vmem_limit = int(min(max(vmem_needed + (4 << 20), 16 << 20), 64 << 20))

    kernel = functools.partial(
        _chexzero_kernel, row_tile=row_tile, col_tile=col_tile,
        n_chunks=n_chunks, n_valid=N)

    out = pl.pallas_call(
        kernel,
        out_shape=jax.ShapeDtypeStruct((1, 1), jnp.float32),
        grid_spec=pltpu.PrefetchScalarGridSpec(
            num_scalar_prefetch=0,
            grid=(n_tiles,),
            in_specs=[
                pl.BlockSpec(memory_space=pltpu.MemorySpace.SMEM),           # log_scale
                pl.BlockSpec((row_tile, D), lambda i: (i, 0)),               # image tile
                pl.BlockSpec((row_tile, 1), lambda i: (i, 0)),               # row labels
                pl.BlockSpec((n_chunks, 1, col_tile), lambda i: (0, 0, 0)),  # col labels
                pl.BlockSpec(memory_space=pl.ANY),                           # text (HBM)
            ],
            out_specs=pl.BlockSpec((1, 1), lambda i: (0, 0)),
            scratch_shapes=[
                pltpu.VMEM((n_chunks, col_tile, D), text_features.dtype),  # resident text
                pltpu.VMEM((n_chunks, 1, col_tile), jnp.float32),  # col running max
                pltpu.VMEM((n_chunks, 1, col_tile), jnp.float32),  # col running sum-exp
                pltpu.VMEM((row_tile, 1), jnp.float32),            # row running max
                pltpu.VMEM((row_tile, 1), jnp.float32),            # row running sum-exp
                pltpu.VMEM((1, 1), jnp.float32),                   # image-CE accumulator
                pltpu.VMEM((1, 1), jnp.float32),                   # picked text-logit acc
                pltpu.SemaphoreType.DMA,                           # one-shot text copy
            ],
        ),
        compiler_params=pltpu.CompilerParams(
            dimension_semantics=("arbitrary",),
            vmem_limit_bytes=vmem_limit),
        cost_estimate=pl.CostEstimate(
            flops=2 * Np * Np * D,
            transcendentals=2 * Np * Np,
            bytes_accessed=Np * D * (img_isz + txt_isz) + Np * 8 + 4),
    )(ls, img_p, lab_row, lab_col, txt_chunks)
    return out[0, 0]


def _reference_loss(log_scale, image_features, text_features, labels):
    """Pure-JAX reference matching the PyTorch module with CrossEntropyLoss."""
    scale = jnp.exp(log_scale)
    lpi = scale * image_features @ text_features.T
    lpt = scale * text_features @ image_features.T

    def ce(logits, lab):
        lse = jax.nn.logsumexp(logits, axis=1)
        sel = jnp.take_along_axis(logits, lab[:, None], axis=1)[:, 0]
        return jnp.mean(lse - sel)

    return 0.5 * (ce(lpi, labels) + ce(lpt, labels))


if __name__ == "__main__":
    # Deterministic parameter init, as in the module's __init__.
    log_scale = jnp.float32(np.log(1.0 / 0.07))

    key = jax.random.PRNGKey(0)
    k_img, k_txt, k_img2, k_txt2, k_lab2 = jax.random.split(key, 5)

    # Small CLIP-style batch: 8 paired image/text embeddings of width 32.
    N, D = 8, 32
    image_features = jax.random.normal(k_img, (N, D), dtype=jnp.float32)
    text_features = jax.random.normal(k_txt, (N, D), dtype=jnp.float32)
    labels = jnp.arange(N, dtype=jnp.int32)   # standard CLIP diagonal targets

    loss = chexzero_loss(log_scale, image_features, text_features, labels)
    jax.block_until_ready(loss)
    ref = _reference_loss(log_scale, image_features, text_features, labels)
    np.testing.assert_allclose(np.asarray(loss), np.asarray(ref), rtol=1e-4, atol=1e-4)

    # Larger check: multiple row tiles, multiple column chunks, padding masks
    # and non-diagonal labels.
    N2, D2 = 1000, 64
    img2 = jax.random.normal(k_img2, (N2, D2), dtype=jnp.float32)
    txt2 = jax.random.normal(k_txt2, (N2, D2), dtype=jnp.float32)
    lab2 = jax.random.permutation(k_lab2, N2).astype(jnp.int32)
    loss2 = chexzero_loss(log_scale, img2, txt2, lab2)
    jax.block_until_ready(loss2)
    ref2 = _reference_loss(log_scale, img2, txt2, lab2)
    np.testing.assert_allclose(np.asarray(loss2), np.asarray(ref2), rtol=1e-3, atol=1e-3)

    print("KERNEL_OK")
</pallas_src>

<mosaic_0001>
module attributes {stable_mosaic.version = 11 : i64} {
  func.func @_chexzero_kernel(%arg0: i32, %arg1: memref<1x1xf32, #tpu.memory_space<smem>>, %arg2: memref<128x32xf32, #tpu.memory_space<vmem>>, %arg3: memref<128x1xi32, #tpu.memory_space<vmem>>, %arg4: memref<1x1x128xi32, #tpu.memory_space<vmem>>, %arg5: memref<1x128x32xf32, #tpu.memory_space<any>>, %arg6: memref<1x1xf32, #tpu.memory_space<vmem>>, %arg7: memref<1x128x32xf32, #tpu.memory_space<vmem>>, %arg8: memref<1x1x128xf32, #tpu.memory_space<vmem>>, %arg9: memref<1x1x128xf32, #tpu.memory_space<vmem>>, %arg10: memref<128x1xf32, #tpu.memory_space<vmem>>, %arg11: memref<128x1xf32, #tpu.memory_space<vmem>>, %arg12: memref<1x1xf32, #tpu.memory_space<vmem>>, %arg13: memref<1x1xf32, #tpu.memory_space<vmem>>, %arg14: memref<!tpu.dma_semaphore, #tpu.memory_space<semaphore_mem>>) attributes {dimension_semantics = [#tpu.dimension_semantics<arbitrary>], iteration_bounds = array<i64: 1>, scalar_prefetch = 0 : i64, scratch_operands = 8 : i64, tpu.core_type = #tpu.core_type<tc>, window_params = [{transform_indices = @transform_0, window_bounds = array<i64: 1, 1>}, {transform_indices = @transform_1, window_bounds = array<i64: 128, 32>}, {transform_indices = @transform_2, window_bounds = array<i64: 128, 1>}, {pipeline_mode = #tpu.pipeline_mode<synchronous>, transform_indices = @transform_3, window_bounds = array<i64: 1, 1, 128>}, {}, {pipeline_mode = #tpu.pipeline_mode<synchronous>, transform_indices = @transform_5, window_bounds = array<i64: 1, 1>}]} {
    %c0_i32 = arith.constant 0 : i32
    %0 = arith.cmpi eq, %arg0, %c0_i32 : i32
    %1 = arith.extui %0 : i1 to i32
    %c0_i32_0 = arith.constant 0 : i32
    %2 = arith.cmpi ne, %1, %c0_i32_0 : i32
    scf.if %2 {
      tpu.enqueue_dma source(%arg5 : memref<1x128x32xf32, #tpu.memory_space<any>>) target(%arg7 : memref<1x128x32xf32, #tpu.memory_space<vmem>>) target_semaphore(%arg14 : memref<!tpu.dma_semaphore, #tpu.memory_space<semaphore_mem>>)
      tpu.wait_dma2 semaphore(%arg14 : memref<!tpu.dma_semaphore, #tpu.memory_space<semaphore_mem>>) src(%arg5 : memref<1x128x32xf32, #tpu.memory_space<any>>) dst(%arg7 : memref<1x128x32xf32, #tpu.memory_space<vmem>>)
      %cst_72 = arith.constant -1.000000e+30 : f32
      %121 = vector.broadcast %cst_72 : f32 to vector<1x1x128xf32>
      %c0_73 = arith.constant 0 : index
      %c0_74 = arith.constant 0 : index
      %c0_75 = arith.constant 0 : index
      %122 = vector.load %arg8[%c0_73, %c0_74, %c0_75] : memref<1x1x128xf32, #tpu.memory_space<vmem>>, vector<1x1x128xf32>
      tpu.vector_store %arg8[%c0_73, %c0_74, %c0_75], %121 {strides = array<i32>} : memref<1x1x128xf32, #tpu.memory_space<vmem>>, vector<1x1x128xf32>,
      %cst_76 = arith.constant 0.000000e+00 : f32
      %123 = vector.broadcast %cst_76 : f32 to vector<1x1x128xf32>
      %c0_77 = arith.constant 0 : index
      %c0_78 = arith.constant 0 : index
      %c0_79 = arith.constant 0 : index
      %124 = vector.load %arg9[%c0_77, %c0_78, %c0_79] : memref<1x1x128xf32, #tpu.memory_space<vmem>>, vector<1x1x128xf32>
      tpu.vector_store %arg9[%c0_77, %c0_78, %c0_79], %123 {strides = array<i32>} : memref<1x1x128xf32, #tpu.memory_space<vmem>>, vector<1x1x128xf32>,
      %cst_80 = arith.constant 0.000000e+00 : f32
      %125 = vector.broadcast %cst_80 : f32 to vector<1x1xf32>
      %c0_81 = arith.constant 0 : index
      %c0_82 = arith.constant 0 : index
      %126 = vector.load %arg12[%c0_81, %c0_82] : memref<1x1xf32, #tpu.memory_space<vmem>>, vector<1x1xf32>
      tpu.vector_store %arg12[%c0_81, %c0_82], %125 {strides = array<i32>} : memref<1x1xf32, #tpu.memory_space<vmem>>, vector<1x1xf32>,
      %cst_83 = arith.constant 0.000000e+00 : f32
      %127 = vector.broadcast %cst_83 : f32 to vector<1x1xf32>
      %c0_84 = arith.constant 0 : index
      %c0_85 = arith.constant 0 : index
      %128 = vector.load %arg13[%c0_84, %c0_85] : memref<1x1xf32, #tpu.memory_space<vmem>>, vector<1x1xf32>
      tpu.vector_store %arg13[%c0_84, %c0_85], %127 {strides = array<i32>} : memref<1x1xf32, #tpu.memory_space<vmem>>, vector<1x1xf32>,
    } else {
    }
    %c0 = arith.constant 0 : index
    %c0_1 = arith.constant 0 : index
    %3 = memref.load %arg1[%c0, %c0_1] : memref<1x1xf32, #tpu.memory_space<smem>>
    %4 = math.exp %3 : f32
    %c0_2 = arith.constant 0 : index
    %c0_3 = arith.constant 0 : index
    %5 = vector.load %arg2[%c0_2, %c0_3] : memref<128x32xf32, #tpu.memory_space<vmem>>, vector<128x32xf32>
    %c0_4 = arith.constant 0 : index
    %c0_5 = arith.constant 0 : index
    %6 = vector.load %arg3[%c0_4, %c0_5] : memref<128x1xi32, #tpu.memory_space<vmem>>, vector<128x1xi32>
    %cst = arith.constant -1.000000e+30 : f32
    %7 = vector.broadcast %cst : f32 to vector<128x1xf32>
    %c0_6 = arith.constant 0 : index
    %c0_7 = arith.constant 0 : index
    %8 = vector.load %arg10[%c0_6, %c0_7] : memref<128x1xf32, #tpu.memory_space<vmem>>, vector<128x1xf32>
    tpu.vector_store %arg10[%c0_6, %c0_7], %7 {strides = array<i32>} : memref<128x1xf32, #tpu.memory_space<vmem>>, vector<128x1xf32>,
    %cst_8 = arith.constant 0.000000e+00 : f32
    %9 = vector.broadcast %cst_8 : f32 to vector<128x1xf32>
    %c0_9 = arith.constant 0 : index
    %c0_10 = arith.constant 0 : index
    %10 = vector.load %arg11[%c0_9, %c0_10] : memref<128x1xf32, #tpu.memory_space<vmem>>, vector<128x1xf32>
    tpu.vector_store %arg11[%c0_9, %c0_10], %9 {strides = array<i32>} : memref<128x1xf32, #tpu.memory_space<vmem>>, vector<128x1xf32>,
    %c128_i32 = arith.constant 128 : i32
    %11 = arith.muli %arg0, %c128_i32 : i32
    %12 = tpu.iota {dimensions = array<i32: 0>} : vector<128x128xi32>
    %13 = vector.broadcast %11 : i32 to vector<128x128xi32>
    %14 = arith.addi %12, %13 : vector<128x128xi32>
    %15 = tpu.iota {dimensions = array<i32: 0>} : vector<128x1xi32>
    %16 = vector.broadcast %11 : i32 to vector<128x1xi32>
    %17 = arith.addi %15, %16 : vector<128x1xi32>
    %c8_i32 = arith.constant 8 : i32
    %18 = vector.broadcast %c8_i32 : i32 to vector<128x1xi32>
    %19 = arith.cmpi slt, %17, %18 : vector<128x1xi32>
    %c0_11 = arith.constant 0 : index
    %c0_12 = arith.constant 0 : index
    %c0_13 = arith.constant 0 : index
    %20 = vector.load %arg7[%c0_11, %c0_12, %c0_13] : memref<1x128x32xf32, #tpu.memory_space<vmem>>, vector<1x128x32xf32>
    %21 = vector.shape_cast %20 : vector<1x128x32xf32> to vector<128x32xf32>
    %c0_14 = arith.constant 0 : index
    %c0_15 = arith.constant 0 : index
    %c0_16 = arith.constant 0 : index
    %22 = vector.load %arg4[%c0_14, %c0_15, %c0_16] : memref<1x1x128xi32, #tpu.memory_space<vmem>>, vector<1x1x128xi32>
    %23 = vector.shape_cast %22 : vector<1x1x128xi32> to vector<1x128xi32>
    %cst_17 = arith.constant dense<0.000000e+00> : vector<128x128xf32>
    %24 = tpu.matmul %5, %21, %cst_17 {dimension_numbers = #tpu.dot_dimension_numbers<[1], [1], [0], [0], [0, 0, 1, 0], [], []>} : vector<128x32xf32>, vector<128x32xf32>, vector<128x128xf32> -> vector<128x128xf32>
    %25 = vector.broadcast %4 : f32 to vector<128x128xf32>
    %26 = arith.mulf %24, %25 : vector<128x128xf32>
    %27 = tpu.iota {dimensions = array<i32: 1>} : vector<128x128xi32>
    %c0_i32_18 = arith.constant 0 : i32
    %28 = vector.broadcast %c0_i32_18 : i32 to vector<128x128xi32>
    %29 = arith.addi %27, %28 : vector<128x128xi32>
    %30 = vector.extract_strided_slice %29 {offsets = [0, 0], sizes = [1, 128], strides = [1, 1]} : vector<128x128xi32> to vector<1x128xi32>
    %c8_i32_19 = arith.constant 8 : i32
    %31 = vector.broadcast %c8_i32_19 : i32 to vector<1x128xi32>
    %32 = arith.cmpi slt, %30, %31 : vector<1x128xi32>
    %cst_20 = arith.constant -1.000000e+30 : f32
    %33 = vector.shape_cast %32 : vector<1x128xi1> to vector<1x128xi1>
    %34 = vector.broadcast %33 : vector<1x128xi1> to vector<128x128xi1>
    %35 = vector.broadcast %cst_20 : f32 to vector<128x128xf32>
    %36 = arith.select %34, %26, %35 : vector<128x128xi1>, vector<128x128xf32>
    %c0_21 = arith.constant 0 : index
    %c0_22 = arith.constant 0 : index
    %37 = vector.load %arg10[%c0_21, %c0_22] : memref<128x1xf32, #tpu.memory_space<vmem>>, vector<128x1xf32>
    %cst_23 = arith.constant dense<0xFF800000> : vector<128xf32>
    %38 = vector.multi_reduction <maximumf>, %36, %cst_23 [1] : vector<128x128xf32> to vector<128xf32>
    %39 = vector.shape_cast %38 : vector<128xf32> to vector<128x1xf32>
    %40 = arith.maximumf %37, %39 : vector<128x1xf32>
    %c0_24 = arith.constant 0 : index
    %c0_25 = arith.constant 0 : index
    %41 = vector.load %arg11[%c0_24, %c0_25] : memref<128x1xf32, #tpu.memory_space<vmem>>, vector<128x1xf32>
    %c0_26 = arith.constant 0 : index
    %c0_27 = arith.constant 0 : index
    %42 = vector.load %arg10[%c0_26, %c0_27] : memref<128x1xf32, #tpu.memory_space<vmem>>, vector<128x1xf32>
    %43 = arith.subf %42, %40 : vector<128x1xf32>
    %44 = math.exp %43 : vector<128x1xf32>
    %45 = arith.mulf %41, %44 : vector<128x1xf32>
    %46 = vector.broadcast %40 : vector<128x1xf32> to vector<128x128xf32>
    %47 = arith.subf %36, %46 : vector<128x128xf32>
    %48 = math.exp %47 : vector<128x128xf32>
    %cst_28 = arith.constant dense<0.000000e+00> : vector<128xf32>
    %49 = vector.multi_reduction <add>, %48, %cst_28 [1] : vector<128x128xf32> to vector<128xf32>
    %50 = vector.shape_cast %49 : vector<128xf32> to vector<128x1xf32>
    %51 = arith.addf %45, %50 : vector<128x1xf32>
    %c0_29 = arith.constant 0 : index
    %c0_30 = arith.constant 0 : index
    %52 = vector.load %arg11[%c0_29, %c0_30] : memref<128x1xf32, #tpu.memory_space<vmem>>, vector<128x1xf32>
    tpu.vector_store %arg11[%c0_29, %c0_30], %51 {strides = array<i32>} : memref<128x1xf32, #tpu.memory_space<vmem>>, vector<128x1xf32>,
    %c0_31 = arith.constant 0 : index
    %c0_32 = arith.constant 0 : index
    %53 = vector.load %arg10[%c0_31, %c0_32] : memref<128x1xf32, #tpu.memory_space<vmem>>, vector<128x1xf32>
    tpu.vector_store %arg10[%c0_31, %c0_32], %40 {strides = array<i32>} : memref<128x1xf32, #tpu.memory_space<vmem>>, vector<128x1xf32>,
    %cst_33 = arith.constant -1.000000e+30 : f32
    %54 = vector.shape_cast %19 : vector<128x1xi1> to vector<128x1xi1>
    %55 = vector.broadcast %54 : vector<128x1xi1> to vector<128x128xi1>
    %56 = vector.broadcast %cst_33 : f32 to vector<128x128xf32>
    %57 = arith.select %55, %26, %56 : vector<128x128xi1>, vector<128x128xf32>
    %c0_34 = arith.constant 0 : index
    %c0_35 = arith.constant 0 : index
    %c0_36 = arith.constant 0 : index
    %58 = vector.load %arg8[%c0_34, %c0_35, %c0_36] : memref<1x1x128xf32, #tpu.memory_space<vmem>>, vector<1x1x128xf32>
    %59 = vector.shape_cast %58 : vector<1x1x128xf32> to vector<1x128xf32>
    %cst_37 = arith.constant dense<0xFF800000> : vector<128xf32>
    %60 = vector.multi_reduction <maximumf>, %57, %cst_37 [0] : vector<128x128xf32> to vector<128xf32>
    %61 = vector.shape_cast %60 : vector<128xf32> to vector<1x128xf32>
    %62 = arith.maximumf %59, %61 : vector<1x128xf32>
    %c0_38 = arith.constant 0 : index
    %c0_39 = arith.constant 0 : index
    %c0_40 = arith.constant 0 : index
    %63 = vector.load %arg9[%c0_38, %c0_39, %c0_40] : memref<1x1x128xf32, #tpu.memory_space<vmem>>, vector<1x1x128xf32>
    %64 = vector.shape_cast %63 : vector<1x1x128xf32> to vector<1x128xf32>
    %65 = arith.subf %59, %62 : vector<1x128xf32>
    %66 = math.exp %65 : vector<1x128xf32>
    %67 = arith.mulf %64, %66 : vector<1x128xf32>
    %68 = vector.broadcast %62 : vector<1x128xf32> to vector<128x128xf32>
    %69 = arith.subf %57, %68 : vector<128x128xf32>
    %70 = math.exp %69 : vector<128x128xf32>
    %cst_41 = arith.constant dense<0.000000e+00> : vector<128xf32>
    %71 = vector.multi_reduction <add>, %70, %cst_41 [0] : vector<128x128xf32> to vector<128xf32>
    %72 = vector.shape_cast %71 : vector<128xf32> to vector<1x128xf32>
    %73 = arith.addf %67, %72 : vector<1x128xf32>
    %c0_42 = arith.constant 0 : index
    %c0_43 = arith.constant 0 : index
    %c0_44 = arith.constant 0 : index
    %74 = vector.load %arg9[%c0_42, %c0_43, %c0_44] : memref<1x1x128xf32, #tpu.memory_space<vmem>>, vector<1x1x128xf32>
    %75 = vector.shape_cast %74 : vector<1x1x128xf32> to vector<1x128xf32>
    %76 = vector.shape_cast %73 : vector<1x128xf32> to vector<1x1x128xf32>
    tpu.vector_store %arg9[%c0_42, %c0_43, %c0_44], %76 {strides = array<i32>} : memref<1x1x128xf32, #tpu.memory_space<vmem>>, vector<1x1x128xf32>,
    %c0_45 = arith.constant 0 : index
    %c0_46 = arith.constant 0 : index
    %c0_47 = arith.constant 0 : index
    %77 = vector.load %arg8[%c0_45, %c0_46, %c0_47] : memref<1x1x128xf32, #tpu.memory_space<vmem>>, vector<1x1x128xf32>
    %78 = vector.shape_cast %77 : vector<1x1x128xf32> to vector<1x128xf32>
    %79 = vector.shape_cast %62 : vector<1x128xf32> to vector<1x1x128xf32>
    tpu.vector_store %arg8[%c0_45, %c0_46, %c0_47], %79 {strides = array<i32>} : memref<1x1x128xf32, #tpu.memory_space<vmem>>, vector<1x1x128xf32>,
    %c0_48 = arith.constant 0 : index
    %c0_49 = arith.constant 0 : index
    %80 = vector.load %arg12[%c0_48, %c0_49] : memref<1x1xf32, #tpu.memory_space<vmem>>, vector<1x1xf32>
    %81 = vector.broadcast %6 : vector<128x1xi32> to vector<128x128xi32>
    %82 = arith.cmpi eq, %29, %81 : vector<128x128xi32>
    %cst_50 = arith.constant 0.000000e+00 : f32
    %83 = vector.broadcast %cst_50 : f32 to vector<128x128xf32>
    %84 = arith.select %82, %26, %83 : vector<128x128xi1>, vector<128x128xf32>
    %85 = vector.shape_cast %84 : vector<128x128xf32> to vector<1x128x128xf32>
    %cst_51 = arith.constant dense<0.000000e+00> : vector<1xf32>
    %86 = vector.multi_reduction <add>, %85, %cst_51 [1, 2] : vector<1x128x128xf32> to vector<1xf32>
    %87 = vector.shape_cast %86 : vector<1xf32> to vector<1x1x1xf32>
    %88 = vector.extract %87[0, 0, 0] : f32 from vector<1x1x1xf32>
    %89 = vector.broadcast %88 : f32 to vector<1x1xf32>
    %90 = arith.subf %80, %89 : vector<1x1xf32>
    %c0_52 = arith.constant 0 : index
    %c0_53 = arith.constant 0 : index
    %91 = vector.load %arg12[%c0_52, %c0_53] : memref<1x1xf32, #tpu.memory_space<vmem>>, vector<1x1xf32>
    tpu.vector_store %arg12[%c0_52, %c0_53], %90 {strides = array<i32>} : memref<1x1xf32, #tpu.memory_space<vmem>>, vector<1x1xf32>,
    %c0_54 = arith.constant 0 : index
    %c0_55 = arith.constant 0 : index
    %92 = vector.load %arg13[%c0_54, %c0_55] : memref<1x1xf32, #tpu.memory_space<vmem>>, vector<1x1xf32>
    %93 = vector.broadcast %23 : vector<1x128xi32> to vector<128x128xi32>
    %94 = arith.cmpi eq, %14, %93 : vector<128x128xi32>
    %cst_56 = arith.constant 0.000000e+00 : f32
    %95 = vector.broadcast %cst_56 : f32 to vector<128x128xf32>
    %96 = arith.select %94, %26, %95 : vector<128x128xi1>, vector<128x128xf32>
    %97 = vector.shape_cast %96 : vector<128x128xf32> to vector<1x128x128xf32>
    %cst_57 = arith.constant dense<0.000000e+00> : vector<1xf32>
    %98 = vector.multi_reduction <add>, %97, %cst_57 [1, 2] : vector<1x128x128xf32> to vector<1xf32>
    %99 = vector.shape_cast %98 : vector<1xf32> to vector<1x1x1xf32>
    %100 = vector.extract %99[0, 0, 0] : f32 from vector<1x1x1xf32>
    %101 = vector.broadcast %100 : f32 to vector<1x1xf32>
    %102 = arith.addf %92, %101 : vector<1x1xf32>
    %c0_58 = arith.constant 0 : index
    %c0_59 = arith.constant 0 : index
    %103 = vector.load %arg13[%c0_58, %c0_59] : memref<1x1xf32, #tpu.memory_space<vmem>>, vector<1x1xf32>
    tpu.vector_store %arg13[%c0_58, %c0_59], %102 {strides = array<i32>} : memref<1x1xf32, #tpu.memory_space<vmem>>, vector<1x1xf32>,
    %c0_60 = arith.constant 0 : index
    %c0_61 = arith.constant 0 : index
    %104 = vector.load %arg10[%c0_60, %c0_61] : memref<128x1xf32, #tpu.memory_space<vmem>>, vector<128x1xf32>
    %c0_62 = arith.constant 0 : index
    %c0_63 = arith.constant 0 : index
    %105 = vector.load %arg11[%c0_62, %c0_63] : memref<128x1xf32, #tpu.memory_space<vmem>>, vector<128x1xf32>
    %106 = math.log %105 : vector<128x1xf32>
    %107 = arith.addf %104, %106 : vector<128x1xf32>
    %c0_64 = arith.constant 0 : index
    %c0_65 = arith.constant 0 : index
    %108 = vector.load %arg12[%c0_64, %c0_65] : memref<1x1xf32, #tpu.memory_space<vmem>>, vector<1x1xf32>
    %cst_66 = arith.constant 0.000000e+00 : f32
    %109 = vector.broadcast %cst_66 : f32 to vector<128x1xf32>
    %110 = arith.select %19, %107, %109 : vector<128x1xi1>, vector<128x1xf32>
    %111 = vector.shape_cast %110 : vector<128x1xf32> to vector<1x128x1xf32>
    %cst_67 = arith.constant dense<0.000000e+00> : vector<1xf32>
    %112 = vector.multi_reduction <add>, %111, %cst_67 [1, 2] : vector<1x128x1xf32> to vector<1xf32>
    %113 = vector.shape_cast %112 : vector<1xf32> to vector<1x1x1xf32>
    %114 = vector.extract %113[0, 0, 0] : f32 from vector<1x1x1xf32>
    %115 = vector.broadcast %114 : f32 to vector<1x1xf32>
    %116 = arith.addf %108, %115 : vector<1x1xf32>
    %c0_68 = arith.constant 0 : index
    %c0_69 = arith.constant 0 : index
    %117 = vector.load %arg12[%c0_68, %c0_69] : memref<1x1xf32, #tpu.memory_space<vmem>>, vector<1x1xf32>
    tpu.vector_store %arg12[%c0_68, %c0_69], %116 {strides = array<i32>} : memref<1x1xf32, #tpu.memory_space<vmem>>, vector<1x1xf32>,
    %c0_i32_70 = arith.constant 0 : i32
    %118 = arith.cmpi eq, %arg0, %c0_i32_70 : i32
    %119 = arith.extui %118 : i1 to i32
    %c0_i32_71 = arith.constant 0 : i32
    %120 = arith.cmpi ne, %119, %c0_i32_71 : i32
    scf.if %120 {
      %c0_72 = arith.constant 0 : index
      %c0_73 = arith.constant 0 : index
      %c0_74 = arith.constant 0 : index
      %121 = vector.load %arg8[%c0_72, %c0_73, %c0_74] : memref<1x1x128xf32, #tpu.memory_space<vmem>>, vector<1x1x128xf32>
      %c0_75 = arith.constant 0 : index
      %c0_76 = arith.constant 0 : index
      %c0_77 = arith.constant 0 : index
      %122 = vector.load %arg9[%c0_75, %c0_76, %c0_77] : memref<1x1x128xf32, #tpu.memory_space<vmem>>, vector<1x1x128xf32>
      %123 = math.log %122 : vector<1x1x128xf32>
      %124 = arith.addf %121, %123 : vector<1x1x128xf32>
      %125 = tpu.iota {dimensions = array<i32: 0>} : vector<1x1x128xi32>
      %c128_i32_78 = arith.constant 128 : i32
      %126 = vector.broadcast %c128_i32_78 : i32 to vector<1x1x128xi32>
      %127 = arith.muli %125, %126 : vector<1x1x128xi32>
      %128 = tpu.iota {dimensions = array<i32: 2>} : vector<1x1x128xi32>
      %129 = arith.addi %127, %128 : vector<1x1x128xi32>
      %c8_i32_79 = arith.constant 8 : i32
      %130 = vector.broadcast %c8_i32_79 : i32 to vector<1x1x128xi32>
      %131 = arith.cmpi slt, %129, %130 : vector<1x1x128xi32>
      %cst_80 = arith.constant 0.000000e+00 : f32
      %132 = vector.broadcast %cst_80 : f32 to vector<1x1x128xf32>
      %133 = arith.select %131, %124, %132 : vector<1x1x128xi1>, vector<1x1x128xf32>
      %134 = vector.shape_cast %133 : vector<1x1x128xf32> to vector<1x1x1x128xf32>
      %cst_81 = arith.constant dense<0.000000e+00> : vector<1xf32>
      %135 = vector.multi_reduction <add>, %134, %cst_81 [1, 2, 3] : vector<1x1x1x128xf32> to vector<1xf32>
      %136 = vector.shape_cast %135 : vector<1xf32> to vector<1x1x1x1xf32>
      %137 = vector.extract %136[0, 0, 0, 0] : f32 from vector<1x1x1x1xf32>
      %c0_82 = arith.constant 0 : index
      %c0_83 = arith.constant 0 : index
      %138 = vector.load %arg12[%c0_82, %c0_83] : memref<1x1xf32, #tpu.memory_space<vmem>>, vector<1x1xf32>
      %cst_84 = arith.constant 1.250000e-01 : f32
      %139 = vector.broadcast %cst_84 : f32 to vector<1x1xf32>
      %140 = arith.mulf %138, %139 : vector<1x1xf32>
      %c0_85 = arith.constant 0 : index
      %c0_86 = arith.constant 0 : index
      %141 = vector.load %arg13[%c0_85, %c0_86] : memref<1x1xf32, #tpu.memory_space<vmem>>, vector<1x1xf32>
      %142 = vector.broadcast %137 : f32 to vector<1x1xf32>
      %143 = arith.subf %142, %141 : vector<1x1xf32>
      %cst_87 = arith.constant 1.250000e-01 : f32
      %144 = vector.broadcast %cst_87 : f32 to vector<1x1xf32>
      %145 = arith.mulf %143, %144 : vector<1x1xf32>
      %146 = arith.addf %140, %145 : vector<1x1xf32>
      %cst_88 = arith.constant 5.000000e-01 : f32
      %147 = vector.broadcast %cst_88 : f32 to vector<1x1xf32>
      %148 = arith.mulf %147, %146 : vector<1x1xf32>
      %c0_89 = arith.constant 0 : index
      %c0_90 = arith.constant 0 : index
      %149 = vector.load %arg6[%c0_89, %c0_90] : memref<1x1xf32, #tpu.memory_space<vmem>>, vector<1x1xf32>
      tpu.vector_store %arg6[%c0_89, %c0_90], %148 {strides = array<i32>} : memref<1x1xf32, #tpu.memory_space<vmem>>, vector<1x1xf32>,
    } else {
    }
    return
  }
  func.func @transform_0(%arg0: i32) -> (i32, i32) {
    %c0_i32 = arith.constant 0 : i32
    %c0_i32_0 = arith.constant 0 : i32
    %c0_i32_1 = arith.constant 0 : i32
    return %c0_i32, %c0_i32_0 : i32, i32
  }
  func.func @transform_1(%arg0: i32) -> (i32, i32) {
    %c0_i32 = arith.constant 0 : i32
    %c0_i32_0 = arith.constant 0 : i32
    return %arg0, %c0_i32 : i32, i32
  }
  func.func @transform_2(%arg0: i32) -> (i32, i32) {
    %c0_i32 = arith.constant 0 : i32
    %c0_i32_0 = arith.constant 0 : i32
    return %arg0, %c0_i32 : i32, i32
  }
  func.func @transform_3(%arg0: i32) -> (i32, i32, i32) {
    %c0_i32 = arith.constant 0 : i32
    %c0_i32_0 = arith.constant 0 : i32
    %c0_i32_1 = arith.constant 0 : i32
    %c0_i32_2 = arith.constant 0 : i32
    return %c0_i32, %c0_i32_0, %c0_i32_1 : i32, i32, i32
  }
  func.func @transform_5(%arg0: i32) -> (i32, i32) {
    %c0_i32 = arith.constant 0 : i32
    %c0_i32_0 = arith.constant 0 : i32
    %c0_i32_1 = arith.constant 0 : i32
    return %c0_i32, %c0_i32_0 : i32, i32
  }
}

</mosaic_0001>

<bundles_post_ra>
// kernel: tpu_custom_call.1
= control target key start
LH: loop header
LB: loop body
LE: loop exit
PB: predicated region body
PF: predicated region fallthrough
CT: control target
= control target key end

     0   :  { %11 = vsyncpa [#allocation12], 0  ;;  %s2382_s0 = inlined_call_operand.<no memory space> [shape: f32[1,1], index: 0, kind: input, shape index: {}]   ;;  %s2383_s1 = inlined_call_operand.vmem [shape: f32[128,32], index: 1, kind: input, shape index: {}]   ;;  %s2384_s2 = inlined_call_operand.vmem [shape: s32[128,1], index: 2, kind: input, shape index: {}]   ;;  %s2385_s3 = inlined_call_operand.vmem [shape: s32[1,1,128], index: 3, kind: input, shape index: {}]   ;;  %s2386_s4 = inlined_call_operand.vmem [shape: f32[1,128,32], index: 4, kind: input, shape index: {}]   ;;  %s2387_s5 = inlined_call_operand.hbm [shape: f32[1,1], index: 5, kind: output, shape index: {}]  }
   0x1   :  { %v1527_v0 = vld [vmem:[%s2386_s4] sm:$0xff]  ;;  %v1532_v1 = vld [vmem:[%s2386_s4 + $0x8] sm:$0xff]  ;;  %v1537_v2 = vld [vmem:[%s2386_s4 + $0x10] sm:$0xff] }
   0x2   :  { %v1542_v3 = vld [vmem:[%s2386_s4 + $0x18] sm:$0xff]  ;;  %v1547_v4 = vld [vmem:[%s2386_s4 + $0x20] sm:$0xff]  ;;  %v1552_v5 = vld [vmem:[%s2386_s4 + $0x28] sm:$0xff] }
   0x3   :  { %v46_v6 = vld [vmem:[%s2386_s4 + $0x30] sm:$0xff]  ;;  %v48_v7 = vld [vmem:[%s2386_s4 + $0x38] sm:$0xff]  ;;  %v50_v8 = vld [vmem:[%s2386_s4 + $0x40] sm:$0xff] }
   0x4   :  { %v52_v9 = vld [vmem:[%s2386_s4 + $0x48] sm:$0xff]  ;;  %v54_v10 = vld [vmem:[%s2386_s4 + $0x50] sm:$0xff]  ;;  %v56_v11 = vld [vmem:[%s2386_s4 + $0x58] sm:$0xff] }
   0x5   :  { %v58_v12 = vld [vmem:[%s2386_s4 + $0x60] sm:$0xff]  ;;  %v60_v13 = vld [vmem:[%s2386_s4 + $0x68] sm:$0xff]  ;;  %v62_v14 = vld [vmem:[%s2386_s4 + $0x70] sm:$0xff] }
   0x6   :  { %v64_v15 = vld [vmem:[%s2386_s4 + $0x78] sm:$0xff] }
   0x7   :  { %71 = vsyncadd [#allocation9], 2048  ;;  %vm219_vm0 = vcmask 261120  }
   0x8   :  { %1486 = dma.done.wait [#allocation9], 2048 }
   0x9   :  { %1487 = vsyncadd [#allocation9], 4294965248  ;;  %1287 = vmatpush.xpose.msk.msra.mxu0 %vm219_vm0, %v64_v15  ;;  %1320 = vmatpush.xpose.msk.msra.mxu1 %vm219_vm0, %v64_v15  ;;  %v103_v16 = vld [vmem:[%s2384_s2 + $0x8] sm:$0xff]  ;;  %v1490_v17 = vmov 0   ;;  %v106_v18 = vld [vmem:[%s2384_s2 + $0x20] sm:$0xff]  ;;  %v82_v23 = vstv %s2382_s0  ;;  %v2388_v46 = vmov 0.0   ;;  %v152_v48 = vlaneseq }
   0xa   :  { %1321 = vmatpush.xpose.msk.msra.mxu2 %vm219_vm0, %v64_v15  ;;  %1322 = vmatpush.xpose.msk.msra.mxu3 %vm219_vm0, %v64_v15  ;;  %v102_v19 = vld [vmem:[%s2384_s2] sm:$0xff]  ;;  %v105_v20 = vld [vmem:[%s2384_s2 + $0x18] sm:$0xff]  ;;  %v104_v21 = vld [vmem:[%s2384_s2 + $0x10] sm:$0xff]  ;;  %v83_v25 = vmul.f32 1.442695, %v82_v23  ;;  %s1493_s0 = smov [#allocation11]  }
   0xb   :  { %1383 = vset.pattern.permute.xlu0 %v1490_v17  ;;  %1382 = vset.pattern.permute.xlu1 %v1490_v17  ;;  %v108_v22 = vld [vmem:[%s2384_s2 + $0x30] sm:$0xff]  ;;  %v109_v24 = vld [vmem:[%s2384_s2 + $0x38] sm:$0xff]  ;;  %v86_v26 = vld [vmem:[%s2383_s1] sm:$0xff]  ;;  %v1491_v45 = vmov -1e+30   ;;  %v1768_v49 = vand.u32 127, %v152_v48 }
   0xc   :  { %927 = vperm.xlu0 %1383, %v103_v16   ;;  %1384 = vset.pattern.permute.xlu2 %v1490_v17  ;;  %1386 = vpow2.f32 %v83_v25  ;;  %v90_v27 = vld [vmem:[%s2383_s1 + $0x20] sm:$0xff]  ;;  %v107_v30 = vld [vmem:[%s2384_s2 + $0x28] sm:$0xff]  ;;  %v88_v37 = vld [vmem:[%s2383_s1 + $0x10] sm:$0xff]  ;;  %76 = vst [vmem:[#allocation3] sm:$0x1] %v1491_v45  ;;  %v1783_v58 = vshrl.u32 %v152_v48, 7 }
   0xd   :  { %1288 = vmatpush.xpose.msk.msra.mxu0 %vm219_vm0, %v62_v14  ;;  %1323 = vmatpush.xpose.msk.msra.mxu1 %vm219_vm0, %v62_v14  ;;  %v94_v28 = vld [vmem:[%s2383_s1 + $0x40] sm:$0xff]  ;;  %v87_v32 = vld [vmem:[%s2383_s1 + $0x8] sm:$0xff]  ;;  %v92_v38 = vld [vmem:[%s2383_s1 + $0x30] sm:$0xff]  ;;  %77 = vst [vmem:[#allocation4] sm:$0x1] %v2388_v46  ;;  %vm400_vm3 = vcmp.lt.s32.totalorder %v1768_v49, 8 }
   0xe   :  { %1324 = vmatpush.xpose.msk.msra.mxu2 %vm219_vm0, %v62_v14  ;;  %1325 = vmatpush.xpose.msk.msra.mxu3 %vm219_vm0, %v62_v14  ;;  %v98_v29 = vld [vmem:[%s2383_s1 + $0x60] sm:$0xff]  ;;  %v91_v33 = vld [vmem:[%s2383_s1 + $0x28] sm:$0xff]  ;;  %v96_v39 = vld [vmem:[%s2383_s1 + $0x50] sm:$0xff]  ;;  %v155_v15 = vadd.s32 16, %v1783_v58  ;;  %v1871_v48 = vadd.s32 64, %v1783_v58  ;;  %s1266_s15 = sshll.u32 %s1493_s0, 4  ;;  %s1267_s15 = int_to_ptr.vmem [resolvable:$true] %s1266_s15 }
   0xf   :  { %924 = vperm.xlu1 %1382, %v102_v19   ;;  %930 = vperm.xlu2 %1384, %v104_v21   ;;  %v95_v34 = vld [vmem:[%s2383_s1 + $0x48] sm:$0xff]  ;;  %v110_v36 = vld [vmem:[%s2384_s2 + $0x40] sm:$0xff]  ;;  %v100_v40 = vld [vmem:[%s2383_s1 + $0x70] sm:$0xff]  ;;  %s1268_s18 = sshll.u32 %s2387_s5, 4  ;;  %s1269_s18 = int_to_ptr.hbm [resolvable:$true] %s1268_s18 }
  0x10   :  { %v99_v35 = vld [vmem:[%s2383_s1 + $0x68] sm:$0xff]  ;;  %v89_v41 = vld [vmem:[%s2383_s1 + $0x18] sm:$0xff]  ;;  %v1789_v60 = vld [vmem:[%s2385_s3] ss:$0 sm:$0xff] }
  0x11   :  { %1289 = vmatpush.xpose.msk.msra.mxu0 %vm219_vm0, %v60_v13  ;;  %1326 = vmatpush.xpose.msk.msra.mxu1 %vm219_vm0, %v60_v13  ;;  %v93_v42 = vld [vmem:[%s2383_s1 + $0x38] sm:$0xff]  ;;  %vm1033_vm5 = vcmp.eq.s32.totalorder %v1783_v58, %v1789_v60  ;;  %vm1035_vm9 = vcmp.eq.s32.totalorder %v155_v15, %v1789_v60  ;;  %vm1041_vm13 = vcmp.eq.s32.totalorder %v1871_v48, %v1789_v60 }
  0x12   :  { %1327 = vmatpush.xpose.msk.msra.mxu2 %vm219_vm0, %v60_v13  ;;  %1328 = vmatpush.xpose.msk.msra.mxu3 %vm219_vm0, %v60_v13  ;;  %v1387_v31 = vpop.eup %1386  ;;  %v97_v43 = vld [vmem:[%s2383_s1 + $0x58] sm:$0xff] }
  0x13   :  { %1368 = vpush %v1387_v31  ;;  %v101_v44 = vld [vmem:[%s2383_s1 + $0x78] sm:$0xff] }
  0x14   :  { %936 = vperm.xlu0 %1383, %v106_v18  }
  0x15   :  { %1290 = vmatpush.xpose.msk.msra.mxu0 %vm219_vm0, %v58_v12  ;;  %1329 = vmatpush.xpose.msk.msra.mxu1 %vm219_vm0, %v58_v12 }
  0x16   :  { %1330 = vmatpush.xpose.msk.msra.mxu2 %vm219_vm0, %v58_v12  ;;  %1331 = vmatpush.xpose.msk.msra.mxu3 %vm219_vm0, %v58_v12 }
  0x17   :  { %933 = vperm.xlu1 %1382, %v105_v20   ;;  %939 = vperm.xlu2 %1384, %v107_v30  }
  0x19   :  { %1291 = vmatpush.xpose.msk.msra.mxu0 %vm219_vm0, %v56_v11  ;;  %1332 = vmatpush.xpose.msk.msra.mxu1 %vm219_vm0, %v56_v11 }
  0x1a   :  { %1333 = vmatpush.xpose.msk.msra.mxu2 %vm219_vm0, %v56_v11  ;;  %1334 = vmatpush.xpose.msk.msra.mxu3 %vm219_vm0, %v56_v11 }
  0x1c   :  { %945 = vperm.xlu0 %1383, %v109_v24  }
  0x1d   :  { %1292 = vmatpush.xpose.msk.msra.mxu0 %vm219_vm0, %v54_v10  ;;  %1335 = vmatpush.xpose.msk.msra.mxu1 %vm219_vm0, %v54_v10 }
  0x1e   :  { %1336 = vmatpush.xpose.msk.msra.mxu2 %vm219_vm0, %v54_v10  ;;  %1337 = vmatpush.xpose.msk.msra.mxu3 %vm219_vm0, %v54_v10 }
  0x1f   :  { %942 = vperm.xlu1 %1382, %v108_v22   ;;  %948 = vperm.xlu2 %1384, %v110_v36  }
  0x21   :  { %1293 = vmatpush.xpose.msk.msra.mxu0 %vm219_vm0, %v52_v9  ;;  %1338 = vmatpush.xpose.msk.msra.mxu1 %vm219_vm0, %v52_v9 }
  0x22   :  { %1339 = vmatpush.xpose.msk.msra.mxu2 %vm219_vm0, %v52_v9  ;;  %1340 = vmatpush.xpose.msk.msra.mxu3 %vm219_vm0, %v52_v9 }
  0x25   :  { %1294 = vmatpush.xpose.msk.msra.mxu0 %vm219_vm0, %v50_v8  ;;  %1341 = vmatpush.xpose.msk.msra.mxu1 %vm219_vm0, %v50_v8 }
  0x26   :  { %1342 = vmatpush.xpose.msk.msra.mxu2 %vm219_vm0, %v50_v8  ;;  %1343 = vmatpush.xpose.msk.msra.mxu3 %vm219_vm0, %v50_v8 }
  0x29   :  { %1295 = vmatpush.xpose.msk.msra.mxu0 %vm219_vm0, %v48_v7  ;;  %1344 = vmatpush.xpose.msk.msra.mxu1 %vm219_vm0, %v48_v7 }
  0x2a   :  { %1345 = vmatpush.xpose.msk.msra.mxu2 %vm219_vm0, %v48_v7  ;;  %1346 = vmatpush.xpose.msk.msra.mxu3 %vm219_vm0, %v48_v7 }
  0x2d   :  { %1296 = vmatpush.xpose.msk.msra.mxu0 %vm219_vm0, %v46_v6  ;;  %1347 = vmatpush.xpose.msk.msra.mxu1 %vm219_vm0, %v46_v6 }
  0x2e   :  { %1348 = vmatpush.xpose.msk.msra.mxu2 %vm219_vm0, %v46_v6  ;;  %1349 = vmatpush.xpose.msk.msra.mxu3 %vm219_vm0, %v46_v6 }
  0x31   :  { %1297 = vmatpush.xpose.msk.msra.mxu0 %vm219_vm0, %v1552_v5  ;;  %1350 = vmatpush.xpose.msk.msra.mxu1 %vm219_vm0, %v1552_v5 }
  0x32   :  { %1351 = vmatpush.xpose.msk.msra.mxu2 %vm219_vm0, %v1552_v5  ;;  %1352 = vmatpush.xpose.msk.msra.mxu3 %vm219_vm0, %v1552_v5 }
  0x35   :  { %1298 = vmatpush.xpose.msk.msra.mxu0 %vm219_vm0, %v1547_v4  ;;  %1353 = vmatpush.xpose.msk.msra.mxu1 %vm219_vm0, %v1547_v4 }
  0x36   :  { %1354 = vmatpush.xpose.msk.msra.mxu2 %vm219_vm0, %v1547_v4  ;;  %1355 = vmatpush.xpose.msk.msra.mxu3 %vm219_vm0, %v1547_v4 }
  0x39   :  { %1299 = vmatpush.xpose.msk.msra.mxu0 %vm219_vm0, %v1542_v3  ;;  %1356 = vmatpush.xpose.msk.msra.mxu1 %vm219_vm0, %v1542_v3 }
  0x3a   :  { %1357 = vmatpush.xpose.msk.msra.mxu2 %vm219_vm0, %v1542_v3  ;;  %1358 = vmatpush.xpose.msk.msra.mxu3 %vm219_vm0, %v1542_v3 }
  0x3d   :  { %1300 = vmatpush.xpose.msk.msra.mxu0 %vm219_vm0, %v1537_v2  ;;  %1359 = vmatpush.xpose.msk.msra.mxu1 %vm219_vm0, %v1537_v2 }
  0x3e   :  { %1360 = vmatpush.xpose.msk.msra.mxu2 %vm219_vm0, %v1537_v2  ;;  %1361 = vmatpush.xpose.msk.msra.mxu3 %vm219_vm0, %v1537_v2 }
  0x41   :  { %1301 = vmatpush.xpose.msk.msra.mxu0 %vm219_vm0, %v1532_v1  ;;  %1362 = vmatpush.xpose.msk.msra.mxu1 %vm219_vm0, %v1532_v1 }
  0x42   :  { %1363 = vmatpush.xpose.msk.msra.mxu2 %vm219_vm0, %v1532_v1  ;;  %1364 = vmatpush.xpose.msk.msra.mxu3 %vm219_vm0, %v1532_v1  ;;  %v154_v1 = vadd.s32 8, %v1783_v58 }
  0x44   :  { %s1369_s23 = spop %1368  ;;  %vm1034_vm7 = vcmp.eq.s32.totalorder %v154_v1, %v1789_v60 }
  0x45   :  { %1302 = vmatpush.xpose.msk.msra.mxu0 %vm219_vm0, %v1527_v0  ;;  %1365 = vmatpush.xpose.msk.msra.mxu1 %vm219_vm0, %v1527_v0  ;;  %v1772_v53 = vstv %s1369_s23 }
  0x46   :  { %1366 = vmatpush.xpose.msk.msra.mxu2 %vm219_vm0, %v1527_v0  ;;  %1367 = vmatpush.xpose.msk.msra.mxu3 %vm219_vm0, %v1527_v0 }
  0x48   :  { %1303 = vmatmul.msk.f32.vlgmr.msra.gmra.mxu0 %vm219_vm0, %v86_v26  ;;  %1307 = vmatmul.msk.f32.vlgmr.msra.gmra.mxu1 %vm219_vm0, %v90_v27 }
  0x49   :  { %1311 = vmatmul.msk.f32.vlgmr.msra.gmra.mxu2 %vm219_vm0, %v94_v28  ;;  %1315 = vmatmul.msk.f32.vlgmr.msra.gmra.mxu3 %vm219_vm0, %v98_v29 }
  0x50   :  { %1304 = vmatmul.msk.f32.gmra.mxu0 %vm219_vm0, %v87_v32  ;;  %1308 = vmatmul.msk.f32.gmra.mxu1 %vm219_vm0, %v91_v33 }
  0x51   :  { %1312 = vmatmul.msk.f32.gmra.mxu2 %vm219_vm0, %v95_v34  ;;  %1316 = vmatmul.msk.f32.gmra.mxu3 %vm219_vm0, %v99_v35 }
  0x58   :  { %1305 = vmatmul.msk.f32.gmra.mxu0 %vm219_vm0, %v88_v37  ;;  %1309 = vmatmul.msk.f32.gmra.mxu1 %vm219_vm0, %v92_v38  ;;  %v156_v38 = vadd.s32 24, %v1783_v58 }
  0x59   :  { %1313 = vmatmul.msk.f32.gmra.mxu2 %vm219_vm0, %v96_v39  ;;  %1317 = vmatmul.msk.f32.gmra.mxu3 %vm219_vm0, %v100_v40 }
  0x5a   :  { %vm1036_vm11 = vcmp.eq.s32.totalorder %v156_v38, %v1789_v60 }
  0x60   :  { %1306 = vmatmul.msk.f32.gmra.mxu0 %vm219_vm0, %v89_v41  ;;  %1310 = vmatmul.msk.f32.gmra.mxu1 %vm219_vm0, %v93_v42 }
  0x61   :  { %1314 = vmatmul.msk.f32.gmra.mxu2 %vm219_vm0, %v97_v43  ;;  %1318 = vmatmul.msk.f32.gmra.mxu3 %vm219_vm0, %v101_v44  ;;  %v157_v44 = vadd.s32 32, %v1783_v58 }
  0x63   :  { %vm1037_vm12 = vcmp.eq.s32.totalorder %v157_v44, %v1789_v60 }
  0x69   :  { %v1770_v50 = vpop.permute.xlu2 %930 }
  0x6a   :  { %vm973_vm8 = vcmp.eq.s32.totalorder %v1768_v49, %v1770_v50  ;;  %v158_v50 = vadd.s32 40, %v1783_v58 }
  0x6c   :  { %vm1038_vm14 = vcmp.eq.s32.totalorder %v158_v50, %v1789_v60 }
  0x71   :  { %v940_v3 = vpop.permute.xlu2 %939 }
  0x72   :  { %vm976_vm6 = vcmp.eq.s32.totalorder %v1768_v49, %v940_v3 }
  0x7e   :  { %v928_v47 = vpop.permute.xlu0 %927 }
  0x7f   :  { %vm972_vm4 = vcmp.eq.s32.totalorder %v1768_v49, %v928_v47  ;;  %v1868_v47 = vld [vmem:[#allocation3] sm:$0x1] }
  0x81   :  { %v925_v52 = vpop.permute.xlu1 %924 }
  0x82   :  { %vm971_vm2 = vcmp.eq.s32.totalorder %v1768_v49, %v925_v52 }
  0x86   :  { %v937_v51 = vpop.permute.xlu0 %936 }
  0x87   :  { %vm975_vm1 = vcmp.eq.s32.totalorder %v1768_v49, %v937_v51  ;;  %v159_v51 = vadd.s32 48, %v1783_v58 }
  0x89   :  { %v934_v25 = vpop.permute.xlu1 %933  ;;  %vm1039_vm15 = vcmp.eq.s32.totalorder %v159_v51, %v1789_v60 }
  0x8a   :  { %vm974_vm10 = vcmp.eq.s32.totalorder %v1768_v49, %v934_v25 }
  0x8e   :  { %v946_v25 = vpop.permute.xlu0 %945 }
  0xc5   :  { %v333_v54 = vpop.f32.mrf.mxu0  ;;  %v345_v55 = vpop.f32.mrf.mxu1 }
  0xc6   :  { %v1777_v56 = vmul.f32 %v1772_v53, %v333_v54  ;;  %v1780_v57 = vmul.f32 %v1772_v53, %v345_v55 }
  0xc8   :  { %v820_v59 = vmax.f32 %v1777_v56, -1e+30  ;;  %v1792_v61 = vsel %vm975_vm1, %v1780_v57, 0.0  ;;  %v987_v62 = vsel %vm971_vm2, %v1777_v56, 0.0  ;;  %v1798_v63 = vsel %vm400_vm3, %v1780_v57, -1e+30 }
  0xc9   :  { %v1803_v0 = vsel %vm400_vm3, %v1777_v56, -1e+30  ;;  %443 = vmax.xlane.f32.xlu2 %v1798_v63  ;;  %v1049_v14 = vsel %vm1033_vm5, %v1777_v56, 0.0  ;;  %vm978_vm2 = vcmp.eq.s32.totalorder %v1768_v49, %v946_v25  ;;  %vm118_vm5 = vcmask 7168  }
  0xca   :  { %v824_v2 = vmax.f32 %v820_v59, -1e+30  ;;  %435 = vmax.xlane.f32.xlu0 %v1803_v0  ;;  %123 = vst.msk [vmem:[#allocation5 + $0x20] sm:$0xff] %vm118_vm5, %v1491_v45 }
  0xcb   :  { %119 = vst.msk [vmem:[#allocation5] sm:$0xff] %vm118_vm5, %v1491_v45 }
  0xcc   :  { %v828_v4 = vmax.f32 %v824_v2, -1e+30  ;;  %v357_v5 = vpop.f32.mrf.mxu2  ;;  %v369_v6 = vpop.f32.mrf.mxu3  ;;  %120 = vst.msk [vmem:[#allocation5 + $0x8] sm:$0xff] %vm118_vm5, %v1491_v45 }
  0xcd   :  { %v1813_v7 = vmul.f32 %v1772_v53, %v357_v5  ;;  %v1816_v8 = vmul.f32 %v1772_v53, %v369_v6  ;;  %v336_v9 = vpop.f32.mrf.mxu0  ;;  %v348_v10 = vpop.f32.mrf.mxu1  ;;  %v160_v5 = vadd.s32 56, %v1783_v58  ;;  %121 = vst.msk [vmem:[#allocation5 + $0x10] sm:$0xff] %vm118_vm5, %v1491_v45 }
  0xce   :  { %v832_v11 = vmax.f32 %v828_v4, -1e+30  ;;  %v383_v12 = vmul.f32 %v1772_v53, %v336_v9  ;;  %v1821_v13 = vmul.f32 %v1772_v53, %v348_v10  ;;  %122 = vst.msk [vmem:[#allocation5 + $0x18] sm:$0xff] %vm118_vm5, %v1491_v45 }
  0xcf   :  { %v1833_v22 = vsel %vm400_vm3, %v1813_v7, -1e+30  ;;  %v1838_v23 = vsel %vm400_vm3, %v1816_v8, -1e+30  ;;  %vm1040_vm1 = vcmp.eq.s32.totalorder %v160_v5, %v1789_v60  ;;  %124 = vst.msk [vmem:[#allocation5 + $0x28] sm:$0xff] %vm118_vm5, %v1491_v45 }
  0xd0   :  { %v834_v16 = vmax.f32 %v832_v11, -1e+30  ;;  %v988_v17 = vsel %vm972_vm4, %v383_v12, 0.0  ;;  %v1050_v18 = vsel %vm1034_vm7, %v383_v12, 0.0  ;;  %v1828_v19 = vsel %vm976_vm6, %v1821_v13, 0.0  ;;  %125 = vst.msk [vmem:[#allocation5 + $0x30] sm:$0xff] %vm118_vm5, %v1491_v45 }
  0xd1   :  { %v1003_v20 = vadd.f32 %v988_v17, %v987_v62  ;;  %v1065_v21 = vadd.f32 %v1050_v18, %v1049_v14  ;;  %451 = vmax.xlane.f32.xlu2 %v1833_v22  ;;  %v1859_v41 = vsel %vm400_vm3, %v1821_v13, -1e+30  ;;  %v1863_v42 = vsel %vm400_vm3, %v383_v12, -1e+30  ;;  %v943_v62 = vpop.permute.xlu1 %942  ;;  %126 = vst.msk [vmem:[#allocation5 + $0x38] sm:$0xff] %vm118_vm5, %v1491_v45 }
  0xd2   :  { %v835_v24 = vrot.slane %v834_v16, 4  ;;  %459 = vmax.xlane.f32.xlu0 %v1838_v23  ;;  %vm977_vm0 = vcmp.eq.s32.totalorder %v1768_v49, %v943_v62  ;;  %127 = vst.msk [vmem:[#allocation5 + $0x40] sm:$0xff] %vm118_vm5, %v1491_v45 }
  0xd3   :  { %128 = vst.msk [vmem:[#allocation5 + $0x48] sm:$0xff] %vm118_vm5, %v1491_v45 }
  0xd4   :  { %v836_v26 = vmax.f32 %v834_v16, %v835_v24  ;;  %v360_v27 = vpop.f32.mrf.mxu2  ;;  %v372_v28 = vpop.f32.mrf.mxu3  ;;  %129 = vst.msk [vmem:[#allocation5 + $0x50] sm:$0xff] %vm118_vm5, %v1491_v45 }
  0xd5   :  { %v1845_v29 = vmul.f32 %v1772_v53, %v372_v28  ;;  %v339_v30 = vpop.f32.mrf.mxu0  ;;  %v351_v33 = vpop.f32.mrf.mxu1  ;;  %v1877_v59 = vmul.f32 %v1772_v53, %v360_v27  ;;  %130 = vst.msk [vmem:[#allocation5 + $0x58] sm:$0xff] %vm118_vm5, %v1491_v45 }
  0xd6   :  { %v837_v31 = vrot.slane %v836_v26, 2  ;;  %v384_v32 = vmul.f32 %v1772_v53, %v339_v30  ;;  %v388_v24 = vmul.f32 %v1772_v53, %v351_v33  ;;  %131 = vst.msk [vmem:[#allocation5 + $0x60] sm:$0xff] %vm118_vm5, %v1491_v45 }
  0xd7   :  { %v1852_v34 = vsel %vm400_vm3, %v1845_v29, -1e+30  ;;  %v1915_v17 = vsel %vm400_vm3, %v1877_v59, -1e+30  ;;  %132 = vst.msk [vmem:[#allocation5 + $0x68] sm:$0xff] %vm118_vm5, %v1491_v45 }
  0xd8   :  { %v838_v35 = vmax.f32 %v836_v26, %v837_v31  ;;  %v989_v36 = vsel %vm973_vm8, %v384_v32, 0.0  ;;  %v1051_v37 = vsel %vm1035_vm9, %v384_v32, 0.0  ;;  %461 = vmax.xlane.f32.xlu1 %v1852_v34  ;;  %v1897_v6 = vsel %vm400_vm3, %v384_v32, -1e+30  ;;  %v949_v26 = vpop.permute.xlu2 %948  ;;  %133 = vst.msk [vmem:[#allocation5 + $0x70] sm:$0xff] %vm118_vm5, %v1491_v45 }
  0xd9   :  { %v1004_v39 = vadd.f32 %v1003_v20, %v989_v36  ;;  %v1066_v40 = vadd.f32 %v1065_v21, %v1051_v37  ;;  %445 = vmax.xlane.f32.xlu2 %v1859_v41  ;;  %v1053_v21 = vsel %vm1037_vm12, %v1780_v57, 0.0  ;;  %v1054_v57 = vsel %vm1038_vm14, %v1821_v13, 0.0  ;;  %134 = vst.msk [vmem:[#allocation5 + $0x78] sm:$0xff] %vm118_vm5, %v1491_v45 }
  0xda   :  { %v839_v43 = vrot.slane %v838_v35, 1  ;;  %437 = vmax.xlane.f32.xlu0 %v1863_v42  ;;  %vm979_vm4 = vcmp.eq.s32.totalorder %v1768_v49, %v949_v26  ;;  %v993_v13 = vsel %vm977_vm0, %v388_v24, 0.0  ;;  %135 = vst.msk [vmem:[#allocation6] sm:$0xff] %vm118_vm5, %v2388_v46 }
  0xdb   :  { %136 = vst.msk [vmem:[#allocation6 + $0x8] sm:$0xff] %vm118_vm5, %v2388_v46 }
  0xdc   :  { %v840_v52 = vmax.f32 %v838_v35, %v839_v43  ;;  %v363_v54 = vpop.f32.mrf.mxu2  ;;  %v375_v55 = vpop.f32.mrf.mxu3  ;;  %137 = vst.msk [vmem:[#allocation6 + $0x10] sm:$0xff] %vm118_vm5, %v2388_v46 }
  0xdd   :  { %v1880_v1 = vmul.f32 %v1772_v53, %v375_v55  ;;  %v342_v2 = vpop.f32.mrf.mxu0  ;;  %v354_v15 = vpop.f32.mrf.mxu1  ;;  %v1925_v27 = vmul.f32 %v1772_v53, %v363_v54  ;;  %v1057_v54 = vsel %vm1041_vm13, %v1813_v7, 0.0  ;;  %v995_v55 = vsel %vm979_vm4, %v1813_v7, 0.0  ;;  %138 = vst.msk [vmem:[#allocation6 + $0x18] sm:$0xff] %vm118_vm5, %v2388_v46 }
  0xde   :  { %v1884_v3 = vmax.f32 %v1868_v47, %v840_v52  ;;  %v1888_v4 = vmul.f32 %v1772_v53, %v342_v2  ;;  %v389_v32 = vmul.f32 %v1772_v53, %v354_v15  ;;  %v1958_v52 = vsel %vm400_vm3, %v388_v24, -1e+30  ;;  %139 = vst.msk [vmem:[#allocation6 + $0x20] sm:$0xff] %vm118_vm5, %v2388_v46 }
  0xdf   :  { %v1910_v16 = vsel %vm400_vm3, %v1880_v1, -1e+30  ;;  %140 = vst.msk [vmem:[#allocation6 + $0x28] sm:$0xff] %vm118_vm5, %v2388_v46  ;;  %vm1241_vm13 = vcmask 1040384  }
  0xe0   :  { %v848_v9 = vperm.slane %v1884_v3, 0  ;;  %921 = vst [vmem:[#allocation3] sm:$0x1] %v1884_v3  ;;  %v990_v10 = vsel %vm974_vm10, %v1888_v4, 0.0  ;;  %v1052_v11 = vsel %vm1036_vm11, %v1888_v4, 0.0  ;;  %439 = vmax.xlane.f32.xlu1 %v1897_v6  ;;  %v994_v43 = vsel %vm978_vm2, %v389_v32, 0.0 }
  0xe1   :  { %v1005_v12 = vadd.f32 %v1004_v39, %v990_v10  ;;  %v1067_v14 = vadd.f32 %v1066_v40, %v1052_v11  ;;  %2402 = vst [vmem:[#allocation16_spill] sm:$0xff] %v1910_v16  ;;  %463 = vmax.xlane.f32.xlu2 %v1910_v16  ;;  %v1946_v40 = vsel %vm400_vm3, %v1925_v27, -1e+30  ;;  %v1977_v48 = vsel %vm400_vm3, %v1888_v4, -1e+30 }
  0xe2   :  { %v850_v18 = vsub.f32 %v1777_v56, %v848_v9  ;;  %v851_v20 = vsub.f32 -1e+30, %v848_v9  ;;  %453 = vmax.xlane.f32.xlu0 %v1915_v17  ;;  %141 = vst.msk [vmem:[#allocation6 + $0x30] sm:$0xff] %vm118_vm5, %v2388_v46 }
  0xe3   :  { %v1006_v28 = vadd.f32 %v1005_v12, %v1792_v61  ;;  %v1068_v30 = vadd.f32 %v1067_v14, %v1053_v21  ;;  %v1055_v61 = vsel %vm1039_vm15, %v388_v24, 0.0  ;;  %142 = vst.msk [vmem:[#allocation6 + $0x38] sm:$0xff] %vm118_vm5, %v2388_v46 }
  0xe4   :  { %v866_v56 = vmul.f32 1.442695, %v850_v18  ;;  %v868_v31 = vmul.f32 1.442695, %v851_v20  ;;  %v366_v33 = vpop.f32.mrf.mxu2  ;;  %v378_v62 = vpop.f32.mrf.mxu3  ;;  %v1988_v20 = vsel %vm400_vm3, %v389_v32, -1e+30 }
  0xe5   :  { %v1069_v35 = vadd.f32 %v1068_v30, %v1054_v57  ;;  %v1007_v36 = vadd.f32 %v1006_v28, %v1828_v19  ;;  %v1936_v37 = vmul.f32 %v1772_v53, %v366_v33  ;;  %v1056_v19 = vsel %vm1040_vm1, %v389_v32, 0.0  ;;  %v112_v30 = vld [vmem:[%s2384_s2 + $0x50] sm:$0xff]  ;;  %143 = vst.msk [vmem:[#allocation6 + $0x40] sm:$0xff] %vm118_vm5, %v2388_v46 }
  0xe6   :  { %1388 = vpow2.f32 %v866_v56  ;;  %v1972_v11 = vmul.f32 %v1772_v53, %v378_v62  ;;  %144 = vst.msk [vmem:[#allocation6 + $0x48] sm:$0xff] %vm118_vm5, %v2388_v46 }
  0xe7   :  { %1390 = vpow2.f32 %v868_v31  ;;  %v1070_v38 = vadd.f32 %v1069_v35, %v1055_v61  ;;  %v1008_v39 = vadd.f32 %v1007_v36, %v993_v13  ;;  %v1954_v51 = vsel %vm400_vm3, %v1936_v37, -1e+30  ;;  %v842_v13 = vld [vmem:[#allocation4] sm:$0x1]  ;;  %145 = vst.msk [vmem:[#allocation6 + $0x50] sm:$0xff] %vm118_vm5, %v2388_v46 }
  0xe8   :  { %455 = vmax.xlane.f32.xlu1 %v1946_v40  ;;  %v1983_v14 = vsel %vm400_vm3, %v1972_v11, -1e+30  ;;  %v843_v31 = vsub.f32 %v1868_v47, %v1884_v3  ;;  %146 = vst.msk [vmem:[#allocation6 + $0x58] sm:$0xff] %vm118_vm5, %v2388_v46 }
  0xe9   :  { %v1071_v44 = vadd.f32 %v1070_v38, %v1056_v19  ;;  %v1009_v50 = vadd.f32 %v1008_v39, %v994_v43  ;;  %457 = vmax.xlane.f32.xlu2 %v1954_v51  ;;  %147 = vst.msk [vmem:[#allocation6 + $0x60] sm:$0xff] %vm118_vm5, %v2388_v46 }
  0xea   :  { %447 = vmax.xlane.f32.xlu0 %v1958_v52  ;;  %v844_v33 = vmul.f32 1.442695, %v843_v31  ;;  %148 = vst.msk [vmem:[#allocation6 + $0x68] sm:$0xff] %vm118_vm5, %v2388_v46  ;;  %v2105_v31 = vld [vmem:[#allocation5 + $0x8] sm:$0xff] }
  0xeb   :  { %v1967_v2 = vadd.f32 %v1071_v44, %v1057_v54  ;;  %v1969_v5 = vadd.f32 %v1009_v50, %v995_v55  ;;  %149 = vst.msk [vmem:[#allocation6 + $0x70] sm:$0xff] %vm118_vm5, %v2388_v46  ;;  %v2060_v44 = vld [vmem:[#allocation5 + $0x20] sm:$0xff] }
  0xec   :  { %v1389_v9 = vpop.eup %1388  ;;  %1392 = vpow2.f32 %v844_v33  ;;  %150 = vst.msk [vmem:[#allocation6 + $0x78] sm:$0xff] %vm118_vm5, %v2388_v46  ;;  %v2062_v50 = vld [vmem:[#allocation5] sm:$0xff] }
  0xed   :  { %v1391_v10 = vpop.eup %1390 }
  0xee   :  { %v898_v12 = vadd.f32 %v1391_v10, %v1389_v9 }
  0xf0   :  { %v899_v7 = vadd.f32 %v1391_v10, %v898_v12  ;;  %441 = vmax.xlane.f32.xlu1 %v1977_v48 }
  0xf2   :  { %v900_v15 = vadd.f32 %v1391_v10, %v899_v7  ;;  %465 = vmax.xlane.f32.xlu0 %v1983_v14  ;;  %v1393_v61 = vpop.eup %1392  ;;  %v2079_v7 = vld [vmem:[#allocation5 + $0x40] sm:$0xff] }
  0xf3   :  { %v846_v39 = vmul.f32 %v1393_v61, %v842_v13  ;;  %v2130_v61 = vld [vmem:[#allocation5 + $0x10] sm:$0xff] }
  0xf4   :  { %v901_v18 = vadd.f32 %v1391_v10, %v900_v15  ;;  %v2081_v15 = vld [vmem:[#allocation5 + $0x60] sm:$0xff] }
  0xf5   :  { %2403 = vst [vmem:[#allocation17_spill] sm:$0xff] %v2081_v15 }
  0xf6   :  { %v902_v53 = vadd.f32 %v1391_v10, %v901_v18 }
  0xf8   :  { %v903_v21 = vadd.f32 %v1391_v10, %v902_v53  ;;  %449 = vmax.xlane.f32.xlu1 %v1988_v20 }
  0xfa   :  { %v904_v4 = vadd.f32 %v1391_v10, %v903_v21  ;;  %v111_v21 = vld [vmem:[%s2384_s2 + $0x48] sm:$0xff] }
  0xfc   :  { %v905_v24 = vadd.f32 %v1391_v10, %v904_v4 }
  0xfe   :  { %v906_v25 = vadd.f32 %v1391_v10, %v905_v24 }
 0x100   :  { %v907_v26 = vadd.f32 %v1391_v10, %v906_v25 }
 0x102   :  { %v908_v28 = vadd.f32 %v1391_v10, %v907_v26  ;;  %v2190_v26 = vld [vmem:[#allocation5 + $0x78] sm:$0xff] }
 0x103   :  { %2412 = vst [vmem:[#allocation26_spill] sm:$0xff] %v2190_v26 }
 0x104   :  { %v909_v56 = vadd.f32 %v1391_v10, %v908_v28  ;;  %v2101_v28 = vld [vmem:[#allocation5 + $0x68] sm:$0xff] }
 0x105   :  { %2405 = vst [vmem:[#allocation19_spill] sm:$0xff] %v2101_v28 }
 0x106   :  { %v910_v57 = vadd.f32 %v1391_v10, %v909_v56  ;;  %954 = vperm.xlu0 %1383, %v112_v30   ;;  %v2103_v56 = vld [vmem:[#allocation5 + $0x28] sm:$0xff] }
 0x108   :  { %v911_v32 = vadd.f32 %v1391_v10, %v910_v57 }
 0x10a   :  { %v912_v47 = vadd.f32 %v1391_v10, %v911_v32  ;;  %v116_v10 = vld [vmem:[%s2384_s2 + $0x70] sm:$0xff] }
 0x10c   :  { %v913_v3 = vrot.slane %v912_v47, 4 }
 0x10e   :  { %v914_v35 = vadd.f32 %v913_v3, %v912_v47 }
 0x110   :  { %v915_v36 = vrot.slane %v914_v35, 2 }
 0x112   :  { %v916_v45 = vadd.f32 %v915_v36, %v914_v35 }
 0x114   :  { %v917_v38 = vrot.slane %v916_v45, 1 }
 0x116   :  { %v918_v19 = vadd.f32 %v917_v38, %v916_v45  ;;  %v2132_v38 = vld [vmem:[#allocation5 + $0x70] sm:$0xff] }
 0x117   :  { %2408 = vst [vmem:[#allocation22_spill] sm:$0xff] %v2132_v38 }
 0x118   :  { %v919_v43 = vadd.f32 %v918_v19, %v846_v39  ;;  %v2134_v39 = vld [vmem:[#allocation5 + $0x48] sm:$0xff] }
 0x11a   :  { %920 = vst [vmem:[#allocation4] sm:$0x1] %v919_v43 }
 0x13c   :  { %v444_v54 = vpop.xlane.xlu2 %443 }
 0x13d   :  { %v436_v55 = vpop.xlane.xlu0 %435  ;;  %v2065_v62 = vmax.f32 %v2060_v44, %v444_v54 }
 0x13e   :  { %v2068_v9 = vmax.f32 %v2062_v50, %v436_v55 }
 0x13f   :  { %759 = vst.msk [vmem:[#allocation5 + $0x20] sm:$0xff] %vm118_vm5, %v2065_v62 }
 0x140   :  { %565 = vperm.xlu1 %1382, %v2068_v9   ;;  %755 = vst.msk [vmem:[#allocation5] sm:$0xff] %vm118_vm5, %v2068_v9 }
 0x144   :  { %v452_v18 = vpop.xlane.xlu2 %451 }
 0x145   :  { %v460_v53 = vpop.xlane.xlu0 %459  ;;  %v2087_v4 = vmax.f32 %v2079_v7, %v452_v18 }
 0x146   :  { %v2090_v24 = vmax.f32 %v2081_v15, %v460_v53 }
 0x147   :  { %763 = vst.msk [vmem:[#allocation5 + $0x40] sm:$0xff] %vm118_vm5, %v2087_v4 }
 0x148   :  { %2404 = vst [vmem:[#allocation18_spill] sm:$0xff] %v2090_v24  ;;  %625 = vperm.xlu0 %1383, %v2090_v24   ;;  %951 = vperm.xlu1 %1382, %v111_v21  }
 0x149   :  { %767 = vst.msk [vmem:[#allocation5 + $0x60] sm:$0xff] %vm118_vm5, %v2090_v24 }
 0x14b   :  { %v462_v30 = vpop.xlane.xlu1 %461 }
 0x14c   :  { %v2108_v57 = vmax.f32 %v2101_v28, %v462_v30  ;;  %v446_v32 = vpop.xlane.xlu2 %445  ;;  %v2158_v30 = vld [vmem:[#allocation5 + $0x50] sm:$0xff] }
 0x14d   :  { %v438_v33 = vpop.xlane.xlu0 %437  ;;  %v2115_v3 = vmax.f32 %v2103_v56, %v446_v32  ;;  %2409 = vst [vmem:[#allocation23_spill] sm:$0xff] %v2158_v30 }
 0x14e   :  { %2406 = vst [vmem:[#allocation20_spill] sm:$0xff] %v2108_v57  ;;  %v2118_v35 = vmax.f32 %v2105_v31, %v438_v33  ;;  %v2160_v33 = vld [vmem:[#allocation5 + $0x58] sm:$0xff] }
 0x14f   :  { %768 = vst.msk [vmem:[#allocation5 + $0x68] sm:$0xff] %vm118_vm5, %v2108_v57 }
 0x150   :  { %2407 = vst [vmem:[#allocation21_spill] sm:$0xff] %v2115_v3  ;;  %570 = vperm.xlu2 %1384, %v2118_v35   ;;  %585 = vperm.xlu1 %1382, %v2065_v62  }
 0x151   :  { %760 = vst.msk [vmem:[#allocation5 + $0x28] sm:$0xff] %vm118_vm5, %v2115_v3 }
 0x152   :  { %756 = vst.msk [vmem:[#allocation5 + $0x8] sm:$0xff] %vm118_vm5, %v2118_v35 }
 0x153   :  { %v440_v13 = vpop.xlane.xlu1 %439 }
 0x154   :  { %v2137_v19 = vmax.f32 %v2130_v61, %v440_v13  ;;  %v464_v43 = vpop.xlane.xlu2 %463  ;;  %v2162_v13 = vld [vmem:[#allocation5 + $0x30] sm:$0xff] }
 0x155   :  { %v454_v54 = vpop.xlane.xlu0 %453  ;;  %v2144_v18 = vmax.f32 %v2132_v38, %v464_v43  ;;  %v162_v38 = vadd.s32 72, %v1783_v58 }
 0x156   :  { %757 = vst.msk [vmem:[#allocation5 + $0x10] sm:$0xff] %vm118_vm5, %v2137_v19  ;;  %v2147_v53 = vmax.f32 %v2134_v39, %v454_v54 }
 0x157   :  { %769 = vst.msk [vmem:[#allocation5 + $0x70] sm:$0xff] %vm118_vm5, %v2144_v18  ;;  %vm1042_vm6 = vcmp.eq.s32.totalorder %v162_v38, %v1789_v60  ;;  %v166_v38 = vadd.s32 104, %v1783_v58 }
 0x158   :  { %590 = vperm.xlu2 %1384, %v2115_v3   ;;  %610 = vperm.xlu0 %1383, %v2147_v53   ;;  %764 = vst.msk [vmem:[#allocation5 + $0x48] sm:$0xff] %vm118_vm5, %v2147_v53 }
 0x159   :  { %605 = vperm.xlu1 %1382, %v2087_v4   ;;  %vm1046_vm10 = vcmp.eq.s32.totalorder %v166_v38, %v1789_v60 }
 0x15b   :  { %v456_v32 = vpop.xlane.xlu1 %455 }
 0x15c   :  { %v2165_v43 = vmax.f32 %v2158_v30, %v456_v32  ;;  %v458_v54 = vpop.xlane.xlu2 %457  ;;  %v114_v32 = vld [vmem:[%s2384_s2 + $0x60] sm:$0xff] }
 0x15d   :  { %v448_v47 = vpop.xlane.xlu0 %447  ;;  %v2172_v36 = vmax.f32 %v2160_v33, %v458_v54 }
 0x15e   :  { %2410 = vst [vmem:[#allocation24_spill] sm:$0xff] %v2165_v43  ;;  %v2175_v46 = vmax.f32 %v2162_v13, %v448_v47  ;;  %v2188_v47 = vld [vmem:[#allocation5 + $0x18] sm:$0xff] }
 0x15f   :  { %765 = vst.msk [vmem:[#allocation5 + $0x50] sm:$0xff] %vm118_vm5, %v2165_v43 }
 0x160   :  { %766 = vst.msk [vmem:[#allocation5 + $0x58] sm:$0xff] %vm118_vm5, %v2172_v36  ;;  %630 = vperm.xlu2 %1384, %v2108_v57   ;;  %575 = vperm.xlu0 %1383, %v2137_v19   ;;  %v164_v57 = vadd.s32 88, %v1783_v58 }
 0x161   :  { %761 = vst.msk [vmem:[#allocation5 + $0x30] sm:$0xff] %vm118_vm5, %v2175_v46  ;;  %595 = vperm.xlu1 %1382, %v2175_v46  }
 0x162   :  { %2411 = vst [vmem:[#allocation25_spill] sm:$0xff] %v2188_v47  ;;  %vm1044_vm8 = vcmp.eq.s32.totalorder %v164_v57, %v1789_v60 }
 0x163   :  { %v442_v54 = vpop.xlane.xlu1 %441  ;;  %v1060_v30 = vsel %vm1044_vm8, %v1936_v37, 0.0 }
 0x164   :  { %v2193_v21 = vmax.f32 %v2188_v47, %v442_v54  ;;  %v2209_v54 = vld [vmem:[#allocation5 + $0x38] sm:$0xff]  ;;  %v1062_v47 = vsel %vm1046_vm10, %v1845_v29, 0.0 }
 0x165   :  { %v466_v25 = vpop.xlane.xlu0 %465 }
 0x166   :  { %2413 = vst [vmem:[#allocation27_spill] sm:$0xff] %v2193_v21  ;;  %v2203_v55 = vmax.f32 %v2190_v26, %v466_v25  ;;  %v117_v25 = vld [vmem:[%s2384_s2 + $0x78] sm:$0xff]  ;;  %v168_v26 = vadd.s32 120, %v1783_v58 }
 0x167   :  { %758 = vst.msk [vmem:[#allocation5 + $0x18] sm:$0xff] %vm118_vm5, %v2193_v21 }
 0x168   :  { %770 = vst.msk [vmem:[#allocation5 + $0x78] sm:$0xff] %vm118_vm5, %v2203_v55  ;;  %960 = vperm.xlu0 %1383, %v114_v32   ;;  %615 = vperm.xlu2 %1384, %v2165_v43   ;;  %v113_v32 = vld [vmem:[%s2384_s2 + $0x58] sm:$0xff]  ;;  %v165_v43 = vadd.s32 96, %v1783_v58  ;;  %vm1048_vm12 = vcmp.eq.s32.totalorder %v168_v26, %v1789_v60 }
 0x169   :  { %620 = vperm.xlu1 %1382, %v2172_v36  }
 0x16a   :  { %vm1045_vm9 = vcmp.eq.s32.totalorder %v165_v43, %v1789_v60 }
 0x16b   :  { %v450_v12 = vpop.xlane.xlu1 %449 }
 0x16c   :  { %v2212_v45 = vmax.f32 %v2209_v54, %v450_v12  ;;  %v115_v12 = vld [vmem:[%s2384_s2 + $0x68] sm:$0xff] }
 0x16e   :  { %762 = vst.msk [vmem:[#allocation5 + $0x38] sm:$0xff] %vm118_vm5, %v2212_v45 }
 0x170   :  { %966 = vperm.xlu0 %1383, %v116_v10   ;;  %580 = vperm.xlu2 %1384, %v2193_v21   ;;  %v163_v10 = vadd.s32 80, %v1783_v58 }
 0x171   :  { %957 = vperm.xlu1 %1382, %v113_v32   ;;  %v1058_v32 = vsel %vm1042_vm6, %v1877_v59, 0.0  ;;  %vm78_vm6 = vcmask 0  }
 0x172   :  { %vm1043_vm7 = vcmp.eq.s32.totalorder %v163_v10, %v1789_v60  ;;  %v1073_v28 = vadd.f32 %v1967_v2, %v1058_v32  ;;  %v1061_v10 = vsel %vm1045_vm9, %v1816_v8, 0.0  ;;  %v167_v2 = vadd.s32 112, %v1783_v58 }
 0x174   :  { %vm1047_vm11 = vcmp.eq.s32.totalorder %v167_v2, %v1789_v60 }
 0x175   :  { %v1063_v57 = vsel %vm1047_vm11, %v1880_v1, 0.0 }
 0x178   :  { %600 = vperm.xlu2 %1384, %v2212_v45   ;;  %v955_v60 = vpop.permute.xlu0 %954 }
 0x179   :  { %963 = vperm.xlu1 %1382, %v115_v12   ;;  %v1059_v12 = vsel %vm1043_vm7, %v1925_v27, 0.0  ;;  %vm981_vm14 = vcmp.eq.s32.totalorder %v1768_v49, %v955_v60 }
 0x181   :  { %969 = vperm.xlu1 %1382, %v117_v25   ;;  %v1074_v25 = vadd.f32 %v1073_v28, %v1059_v12 }
 0x183   :  { %v1075_v21 = vadd.f32 %v1074_v25, %v1060_v30  ;;  %v1064_v30 = vsel %vm1048_vm12, %v1972_v11, 0.0 }
 0x185   :  { %v1076_v32 = vadd.f32 %v1075_v21, %v1061_v10  ;;  %v1236_v10 = vld [vmem:[#allocation4] sm:$0x1] }
 0x187   :  { %v1077_v28 = vadd.f32 %v1076_v32, %v1062_v47 }
 0x189   :  { %v1078_v43 = vadd.f32 %v1077_v28, %v1063_v57 }
 0x18b   :  { %v1079_v12 = vadd.f32 %v1078_v43, %v1064_v30 }
 0x1aa   :  { %v571_v25 = vpop.permute.xlu2 %570 }
 0x1ab   :  { %v644_v38 = vsub.f32 %v1863_v42, %v571_v25  ;;  %1080 = vadd.xlane.f32.xlu1 %v1079_v12  ;;  %v1235_v42 = vld [vmem:[#allocation3] sm:$0x1] }
 0x1ad   :  { %v661_v21 = vmul.f32 1.442695, %v644_v38 }
 0x1af   :  { %1394 = vpow2.f32 %v661_v21 }
 0x1b0   :  { %1396 = vlog2.f32 %v1236_v10 }
 0x1b2   :  { %v566_v16 = vpop.permute.xlu1 %565  ;;  %v2256_v57 = vpop.permute.xlu2 %590 }
 0x1b3   :  { %v643_v58 = vsub.f32 %v1803_v0, %v566_v16 }
 0x1b5   :  { %v1395_v47 = vpop.eup %1394  ;;  %v659_v2 = vmul.f32 1.442695, %v643_v58 }
 0x1b6   :  { %693 = vadd.xlane.f32.xlu1 %v1395_v47  ;;  %v1397_v32 = vpop.eup %1396 }
 0x1b7   :  { %1398 = vpow2.f32 %v659_v2  ;;  %v1238_v28 = vmul.f32 0.6931472, %v1397_v32 }
 0x1b9   :  { %v1239_v30 = vadd.f32 %v1238_v28, %v1235_v42 }
 0x1ba   :  { %v952_v26 = vpop.permute.xlu1 %951  ;;  %v2258_v12 = vpop.permute.xlu0 %625 }
 0x1bb   :  { %v1240_v0 = vsel %vm400_vm3, %v1239_v30, 0.0  ;;  %v2262_v16 = vpop.permute.xlu2 %630  ;;  %vm980_vm3 = vcmp.eq.s32.totalorder %v1768_v49, %v952_v26  ;;  %v997_v26 = vsel %vm981_vm14, %v1925_v27, 0.0 }
 0x1bc   :  { %v1242_v38 = vsel %vm1241_vm13, %v1240_v0, 0.0 }
 0x1bd   :  { %v1399_v43 = vpop.eup %1398 }
 0x1be   :  { %691 = vadd.xlane.f32.xlu2 %v1399_v43 }
 0x1c2   :  { %v586_v25 = vpop.permute.xlu1 %585 }
 0x1c3   :  { %v2264_v58 = vpop.permute.xlu2 %615  ;;  %v647_v43 = vsub.f32 %v1798_v63, %v586_v25 }
 0x1c5   :  { %v667_v30 = vmul.f32 1.442695, %v647_v43 }
 0x1c6   :  { %1243 = vadd.xlane.f32.xlu2 %v1242_v38  ;;  %v996_v38 = vsel %vm980_vm3, %v1877_v59, 0.0 }
 0x1c7   :  { %v1011_v63 = vadd.f32 %v1969_v5, %v996_v38 }
 0x1c9   :  { %v1012_v59 = vadd.f32 %v1011_v63, %v997_v26 }
 0x1ca   :  { %v611_v21 = vpop.permute.xlu0 %610 }
 0x1cb   :  { %v606_v10 = vpop.permute.xlu1 %605  ;;  %v2268_v42 = vpop.permute.xlu2 %580 }
 0x1d2   :  { %v576_v47 = vpop.permute.xlu0 %575 }
 0x1d3   :  { %v645_v2 = vsub.f32 %v1897_v6, %v576_v47  ;;  %v596_v32 = vpop.permute.xlu1 %595  ;;  %v601_v25 = vpop.permute.xlu2 %600 }
 0x1d4   :  { %v649_v0 = vsub.f32 %v1958_v52, %v596_v32 }
 0x1d5   :  { %v663_v28 = vmul.f32 1.442695, %v645_v2 }
 0x1d6   :  { %v671_v3 = vmul.f32 1.442695, %v649_v0 }
 0x1d7   :  { %1400 = vpow2.f32 %v663_v28 }
 0x1d8   :  { %1402 = vpow2.f32 %v667_v30 }
 0x1d9   :  { %1404 = vpow2.f32 %v671_v3 }
 0x1da   :  { %v961_v6 = vpop.permute.xlu0 %960 }
 0x1db   :  { %v621_v24 = vpop.permute.xlu1 %620  ;;  %vm983_vm0 = vcmp.eq.s32.totalorder %v1768_v49, %v961_v6 }
 0x1dc   :  { %v999_v43 = vsel %vm983_vm0, %v1816_v8, 0.0 }
 0x1dd   :  { %v1401_v15 = vpop.eup %1400 }
 0x1de   :  { %695 = vadd.xlane.f32.xlu1 %v1401_v15  ;;  %v1403_v2 = vpop.eup %1402  ;;  %v650_v15 = vsub.f32 %v1988_v20, %v601_v25  ;;  %v651_v20 = vsub.f32 %v1833_v22, %v606_v10  ;;  %v652_v25 = vsub.f32 %v1915_v17, %v611_v21 }
 0x1df   :  { %v1405_v5 = vpop.eup %1404 }
 0x1e0   :  { %v673_v28 = vmul.f32 1.442695, %v650_v15  ;;  %v675_v3 = vmul.f32 1.442695, %v651_v20  ;;  %v677_v22 = vmul.f32 1.442695, %v652_v25  ;;  %v2415_v15 = vsub.f32 %v2062_v50, %v2068_v9 }
 0x1e2   :  { %v967_v30 = vpop.permute.xlu0 %966  ;;  %1406 = vpow2.f32 %v673_v28 }
 0x1e3   :  { %v958_v47 = vpop.permute.xlu1 %957  ;;  %vm985_vm2 = vcmp.eq.s32.totalorder %v1768_v49, %v967_v30  ;;  %1408 = vpow2.f32 %v675_v3 }
 0x1e4   :  { %vm982_vm15 = vcmp.eq.s32.totalorder %v1768_v49, %v958_v47  ;;  %v1001_v38 = vsel %vm985_vm2, %v1880_v1, 0.0  ;;  %1410 = vpow2.f32 %v677_v22 }
 0x1e5   :  { %v998_v52 = vsel %vm982_vm15, %v1936_v37, 0.0 }
 0x1e6   :  { %699 = vadd.xlane.f32.xlu1 %v1403_v2  ;;  %v1013_v32 = vadd.f32 %v1012_v59, %v998_v52  ;;  %v654_v2 = vsub.f32 %v1954_v51, %v621_v24  ;;  %v515_v52 = vmul.f32 1.442695, %v2415_v15  ;;  %v484_v24 = vld [vmem:[#allocation6 + $0x8] sm:$0xff]  ;;  %v648_v59 = vsub.f32 %v1859_v41, %v2256_v57  ;;  %v489_v15 = vld [vmem:[#allocation6 + $0x30] sm:$0xff] }
 0x1e8   :  { %v1014_v27 = vadd.f32 %v1013_v32, %v999_v43  ;;  %v1407_v63 = vpop.eup %1406  ;;  %v681_v1 = vmul.f32 1.442695, %v654_v2  ;;  %v655_v43 = vsub.f32 %v1838_v23, %v2258_v12  ;;  %v1092_v23 = vld [vmem:[#allocation5] sm:$0xff] }
 0x1e9   :  { %v1409_v10 = vpop.eup %1408 }
 0x1ea   :  { %v1411_v26 = vpop.eup %1410  ;;  %1412 = vpow2.f32 %v681_v1  ;;  %v683_v30 = vmul.f32 1.442695, %v655_v43  ;;  %v487_v1 = vld [vmem:[#allocation6 + $0x20] sm:$0xff] }
 0x1eb   :  { %v964_v60 = vpop.permute.xlu1 %963 }
 0x1ec   :  { %vm984_vm1 = vcmp.eq.s32.totalorder %v1768_v49, %v964_v60 }
 0x1ed   :  { %v1000_v0 = vsel %vm984_vm1, %v1845_v29, 0.0 }
 0x1ee   :  { %703 = vadd.xlane.f32.xlu1 %v1405_v5  ;;  %v1015_v37 = vadd.f32 %v1014_v27, %v1000_v0  ;;  %v669_v5 = vmul.f32 1.442695, %v648_v59 }
 0x1f0   :  { %v1016_v47 = vadd.f32 %v1015_v37, %v1001_v38  ;;  %v2416_v37 = vsub.f32 %v2130_v61, %v2137_v19  ;;  %v2418_v61 = vsub.f32 %v2162_v13, %v2175_v46 }
 0x1f2   :  { %v519_v3 = vmul.f32 1.442695, %v2416_v37  ;;  %v527_v19 = vmul.f32 1.442695, %v2418_v61  ;;  %v2422_v37 = vsub.f32 %v2160_v33, %v2172_v36  ;;  %v2423_v36 = vmov 0.0  }
 0x1f3   :  { %v970_v6 = vpop.permute.xlu1 %969  ;;  %79 = vst.msk [vmem:[#allocation7] sm:$0x1] %vm78_vm6, %v2423_v36 }
 0x1f4   :  { %vm986_vm4 = vcmp.eq.s32.totalorder %v1768_v49, %v970_v6  ;;  %v1413_v49 = vpop.eup %1412  ;;  %80 = vst.msk [vmem:[#allocation8] sm:$0x1] %vm78_vm6, %v2423_v36  ;;  %v2431_v36 = vld [vmem:[#allocation25_spill] sm:$0xff] }
 0x1f5   :  { %v1002_v8 = vsel %vm986_vm4, %v1972_v11, 0.0  ;;  %v2414_v11 = vsub.f32 %v2105_v31, %v2118_v35  ;;  %v483_v35 = vld [vmem:[#allocation6] sm:$0xff] }
 0x1f6   :  { %705 = vadd.xlane.f32.xlu1 %v1407_v63  ;;  %v1017_v29 = vadd.f32 %v1016_v47, %v1002_v8  ;;  %v2417_v47 = vsub.f32 %v2060_v44, %v2065_v62  ;;  %v2419_v44 = vsub.f32 %v2209_v54, %v2212_v45  ;;  %v490_v54 = vld [vmem:[#allocation6 + $0x38] sm:$0xff] }
 0x1f7   :  { %v517_v17 = vmul.f32 1.442695, %v2414_v11 }
 0x1f8   :  { %1018 = vadd.xlane.f32.xlu0 %v1017_v29  ;;  %v523_v63 = vmul.f32 1.442695, %v2417_v47  ;;  %v485_v29 = vld [vmem:[#allocation6 + $0x10] sm:$0xff]  ;;  %v529_v62 = vmul.f32 1.442695, %v2419_v44  ;;  %v656_v44 = vsub.f32 %v1852_v34, %v2262_v16 }
 0x1f9   :  { %1414 = vpow2.f32 %v517_v17 }
 0x1fa   :  { %1416 = vpow2.f32 %v515_v52  ;;  %v922_v34 = vld [vmem:[#allocation7] sm:$0x1] }
 0x1fb   :  { %1418 = vpow2.f32 %v669_v5 }
 0x1fc   :  { %1420 = vpow2.f32 %v683_v30 }
 0x1fe   :  { %707 = vadd.xlane.f32.xlu1 %v1409_v10 }
 0x1ff   :  { %v1415_v51 = vpop.eup %1414 }
 0x200   :  { %v548_v32 = vmul.f32 %v1415_v51, %v484_v24  ;;  %v1417_v31 = vpop.eup %1416  ;;  %v2420_v51 = vsub.f32 %v2079_v7, %v2087_v4 }
 0x201   :  { %v547_v50 = vmul.f32 %v1417_v31, %v483_v35  ;;  %v1419_v27 = vpop.eup %1418  ;;  %v2421_v31 = vsub.f32 %v2134_v39, %v2147_v53  ;;  %v537_v39 = vmul.f32 1.442695, %v2422_v37 }
 0x202   :  { %v1421_v57 = vpop.eup %1420  ;;  %v531_v24 = vmul.f32 1.442695, %v2420_v51 }
 0x203   :  { %v533_v35 = vmul.f32 1.442695, %v2421_v31 }
 0x206   :  { %709 = vadd.xlane.f32.xlu1 %v1411_v26 }
 0x20c   :  { %640 = vperm.xlu0 %1383, %v2203_v55  }
 0x20e   :  { %713 = vadd.xlane.f32.xlu1 %v1413_v49 }
 0x21e   :  { %v2294_v21 = vpop.xlane.xlu1 %1080 }
 0x21f   :  { %v1082_v59 = vrot.slane %v2294_v21, 4 }
 0x229   :  { %v694_v28 = vpop.xlane.xlu1 %693 }
 0x22a   :  { %v724_v60 = vadd.f32 %v694_v28, %v548_v32  ;;  %v1083_v32 = vadd.f32 %v1082_v59, %v2294_v21  ;;  %v488_v59 = vld [vmem:[#allocation6 + $0x28] sm:$0xff] }
 0x22c   :  { %740 = vst.msk [vmem:[#allocation6 + $0x8] sm:$0xff] %vm118_vm5, %v724_v60  ;;  %v1084_v43 = vrot.slane %v1083_v32, 2 }
 0x231   :  { %v692_v9 = vpop.xlane.xlu2 %691 }
 0x232   :  { %v723_v0 = vadd.f32 %v692_v9, %v547_v50  ;;  %v491_v9 = vld [vmem:[#allocation6 + $0x40] sm:$0xff] }
 0x234   :  { %739 = vst.msk [vmem:[#allocation6] sm:$0xff] %vm118_vm5, %v723_v0  ;;  %v1085_v0 = vadd.f32 %v1084_v43, %v1083_v32 }
 0x236   :  { %701 = vadd.xlane.f32.xlu0 %v1419_v27  ;;  %v1086_v53 = vrot.slane %v1085_v0, 1 }
 0x23b   :  { %v1108_v41 = vld [vmem:[#allocation6] sm:$0xff] }
 0x23c   :  { %1422 = vlog2.f32 %v1108_v41 }
 0x23d   :  { %1424 = vpow2.f32 %v519_v3 }
 0x23e   :  { %715 = vadd.xlane.f32.xlu0 %v1421_v57  ;;  %1426 = vpow2.f32 %v523_v63 }
 0x23f   :  { %1428 = vpow2.f32 %v527_v19 }
 0x240   :  { %1430 = vpow2.f32 %v529_v62 }
 0x241   :  { %1432 = vpow2.f32 %v531_v24 }
 0x242   :  { %v1423_v20 = vpop.eup %1422  ;;  %1434 = vpow2.f32 %v533_v35  ;;  %v495_v35 = vld [vmem:[#allocation6 + $0x60] sm:$0xff] }
 0x243   :  { %v1125_v38 = vmul.f32 0.6931472, %v1423_v20  ;;  %v1425_v8 = vpop.eup %1424  ;;  %1436 = vpow2.f32 %v537_v39 }
 0x244   :  { %v549_v25 = vmul.f32 %v1425_v8, %v485_v29  ;;  %v1427_v2 = vpop.eup %1426  ;;  %v646_v8 = vsub.f32 %v1977_v48, %v2268_v42  ;;  %v653_v42 = vsub.f32 %v1946_v40, %v2264_v58  ;;  %v2424_v40 = vld [vmem:[#allocation21_spill] sm:$0xff] }
 0x245   :  { %v1156_v12 = vadd.f32 %v1125_v38, %v1092_v23  ;;  %v551_v26 = vmul.f32 %v1427_v2, %v487_v1  ;;  %v1429_v17 = vpop.eup %1428  ;;  %v492_v23 = vld [vmem:[#allocation6 + $0x48] sm:$0xff]  ;;  %v2425_v58 = vsub.f32 %v2103_v56, %v2424_v40 }
 0x246   :  { %v553_v52 = vmul.f32 %v1429_v17, %v489_v15  ;;  %v1431_v45 = vpop.eup %1430 }
 0x247   :  { %v1189_v6 = vsel %vm118_vm5, %v1156_v12, 0.0  ;;  %v554_v28 = vmul.f32 %v1431_v45, %v490_v54  ;;  %v1433_v4 = vpop.eup %1432  ;;  %v525_v15 = vmul.f32 1.442695, %v2425_v58  ;;  %v1031_v54 = vld [vmem:[#allocation8] sm:$0x1] }
 0x248   :  { %1220 = vadd.xlane.f32.xlu2 %v1189_v6  ;;  %v555_v41 = vmul.f32 %v1433_v4, %v491_v9  ;;  %v1435_v38 = vpop.eup %1434  ;;  %v1087_v6 = vadd.f32 %v1086_v53, %v1085_v0 }
 0x249   :  { %v556_v47 = vmul.f32 %v1435_v38, %v492_v23  ;;  %v1437_v33 = vpop.eup %1436 }
 0x251   :  { %v696_v22 = vpop.xlane.xlu1 %695 }
 0x252   :  { %v725_v10 = vadd.f32 %v696_v22, %v549_v25  ;;  %v494_v25 = vld [vmem:[#allocation6 + $0x58] sm:$0xff]  ;;  %v665_v22 = vmul.f32 1.442695, %v646_v8 }
 0x253   :  { %v558_v19 = vmul.f32 %v1437_v33, %v494_v25  ;;  %v2430_v8 = vld [vmem:[#allocation26_spill] sm:$0xff]  ;;  %v2432_v33 = vld [vmem:[#allocation27_spill] sm:$0xff] }
 0x254   :  { %741 = vst.msk [vmem:[#allocation6 + $0x10] sm:$0xff] %vm118_vm5, %v725_v10  ;;  %1438 = vpow2.f32 %v665_v22  ;;  %v2433_v25 = vsub.f32 %v2431_v36, %v2432_v33 }
 0x256   :  { %v521_v22 = vmul.f32 1.442695, %v2433_v25 }
 0x259   :  { %v700_v49 = vpop.xlane.xlu1 %699 }
 0x25a   :  { %v727_v11 = vadd.f32 %v700_v49, %v551_v26  ;;  %v679_v26 = vmul.f32 1.442695, %v653_v42  ;;  %v1439_v49 = vpop.eup %1438 }
 0x25c   :  { %743 = vst.msk [vmem:[#allocation6 + $0x20] sm:$0xff] %vm118_vm5, %v727_v11 }
 0x260   :  { %635 = vperm.xlu2 %1384, %v2144_v18  }
 0x261   :  { %v704_v46 = vpop.xlane.xlu1 %703 }
 0x262   :  { %v729_v13 = vadd.f32 %v704_v46, %v553_v52  ;;  %v2426_v52 = vld [vmem:[#allocation17_spill] sm:$0xff]  ;;  %v2427_v46 = vld [vmem:[#allocation18_spill] sm:$0xff] }
 0x264   :  { %745 = vst.msk [vmem:[#allocation6 + $0x30] sm:$0xff] %vm118_vm5, %v729_v13  ;;  %v2428_v13 = vsub.f32 %v2426_v52, %v2427_v46  ;;  %v2437_v52 = vld [vmem:[#allocation19_spill] sm:$0xff]  ;;  %v2438_v46 = vld [vmem:[#allocation20_spill] sm:$0xff] }
 0x266   :  { %v539_v51 = vmul.f32 1.442695, %v2428_v13  ;;  %v2439_v13 = vsub.f32 %v2437_v52, %v2438_v46 }
 0x269   :  { %v706_v60 = vpop.xlane.xlu1 %705 }
 0x26a   :  { %v730_v5 = vadd.f32 %v706_v60, %v554_v28 }
 0x26b   :  { %v1019_v50 = vpop.xlane.xlu0 %1018 }
 0x26c   :  { %746 = vst.msk [vmem:[#allocation6 + $0x38] sm:$0xff] %vm118_vm5, %v730_v5  ;;  %v1020_v7 = vrot.slane %v1019_v50, 4 }
 0x26e   :  { %v1021_v30 = vadd.f32 %v1020_v7, %v1019_v50  ;;  %v1244_v50 = vpop.xlane.xlu2 %1243 }
 0x26f   :  { %v1245_v9 = vrot.slane %v1244_v50, 4 }
 0x270   :  { %v1022_v27 = vrot.slane %v1021_v30, 2 }
 0x271   :  { %v708_v21 = vpop.xlane.xlu1 %707 }
 0x272   :  { %v731_v57 = vadd.f32 %v708_v21, %v555_v41  ;;  %v1023_v20 = vadd.f32 %v1022_v27, %v1021_v30  ;;  %v1246_v30 = vadd.f32 %v1245_v9, %v1244_v50 }
 0x274   :  { %747 = vst.msk [vmem:[#allocation6 + $0x40] sm:$0xff] %vm118_vm5, %v731_v57  ;;  %v1024_v3 = vrot.slane %v1023_v20, 1  ;;  %v1247_v0 = vrot.slane %v1246_v30, 2 }
 0x276   :  { %v1025_v12 = vadd.f32 %v1024_v3, %v1023_v20  ;;  %v1248_v57 = vadd.f32 %v1247_v0, %v1246_v30  ;;  %v2429_v3 = vld [vmem:[#allocation16_spill] sm:$0xff]  ;;  %v2440_v30 = vld [vmem:[#allocation22_spill] sm:$0xff] }
 0x277   :  { %v513_v0 = vsub.f32 %v2440_v30, %v2144_v18 }
 0x278   :  { %1370 = vpush %v1025_v12  ;;  %v1249_v53 = vrot.slane %v1248_v57, 1 }
 0x279   :  { %1372 = vpush %v1087_v6  ;;  %v710_v63 = vpop.xlane.xlu1 %709 }
 0x27a   :  { %v732_v29 = vadd.f32 %v710_v63, %v556_v47  ;;  %v1250_v47 = vadd.f32 %v1249_v53, %v1248_v57 }
 0x27c   :  { %748 = vst.msk [vmem:[#allocation6 + $0x48] sm:$0xff] %vm118_vm5, %v732_v29  ;;  %v514_v29 = vsub.f32 %v2430_v8, %v2203_v55 }
 0x27e   :  { %v641_v10 = vpop.permute.xlu0 %640 }
 0x27f   :  { %v658_v61 = vsub.f32 %v1983_v14, %v641_v10  ;;  %v685_v14 = vmul.f32 1.442695, %v656_v44  ;;  %v545_v10 = vmul.f32 1.442695, %v514_v29 }
 0x281   :  { %v689_v2 = vmul.f32 1.442695, %v658_v61  ;;  %v714_v1 = vpop.xlane.xlu1 %713  ;;  %v2434_v61 = vld [vmem:[#allocation23_spill] sm:$0xff] }
 0x282   :  { %v734_v48 = vadd.f32 %v714_v1, %v558_v19  ;;  %v2435_v19 = vld [vmem:[#allocation24_spill] sm:$0xff] }
 0x283   :  { %1440 = vpow2.f32 %v689_v2  ;;  %v2436_v2 = vsub.f32 %v2434_v61, %v2435_v19 }
 0x284   :  { %750 = vst.msk [vmem:[#allocation6 + $0x58] sm:$0xff] %vm118_vm5, %v734_v48  ;;  %1442 = vpow2.f32 %v679_v26  ;;  %v498_v26 = vld [vmem:[#allocation6 + $0x78] sm:$0xff] }
 0x285   :  { %1444 = vpow2.f32 %v685_v14  ;;  %v535_v1 = vmul.f32 1.442695, %v2436_v2 }
 0x286   :  { %1446 = vpow2.f32 %v525_v15 }
 0x287   :  { %1448 = vpow2.f32 %v539_v51  ;;  %v541_v51 = vmul.f32 1.442695, %v2439_v13 }
 0x289   :  { %v1441_v11 = vpop.eup %1440  ;;  %697 = vadd.xlane.f32.xlu2 %v1439_v49  ;;  %v486_v49 = vld [vmem:[#allocation6 + $0x18] sm:$0xff] }
 0x28a   :  { %721 = vadd.xlane.f32.xlu0 %v1441_v11  ;;  %v1443_v62 = vpop.eup %1442 }
 0x28b   :  { %v1445_v17 = vpop.eup %1444 }
 0x28c   :  { %v1447_v24 = vpop.eup %1446 }
 0x28d   :  { %v552_v16 = vmul.f32 %v1447_v24, %v488_v59  ;;  %v1449_v31 = vpop.eup %1448 }
 0x28e   :  { %v559_v43 = vmul.f32 %v1449_v31, %v495_v35 }
 0x291   :  { %711 = vadd.xlane.f32.xlu2 %v1443_v62 }
 0x299   :  { %717 = vadd.xlane.f32.xlu2 %v1445_v17 }
 0x2a9   :  { %s1371_s2 = spop %1370  ;;  %v702_v45 = vpop.xlane.xlu0 %701 }
 0x2aa   :  { %v1027_v32 = vstv %s1371_s2  ;;  %v728_v28 = vadd.f32 %v702_v45, %v552_v16  ;;  %s1373_s12 = spop %1372  ;;  %v493_v16 = vld [vmem:[#allocation6 + $0x50] sm:$0xff] }
 0x2ab   :  { %v1028_v60 = vsub.f32 %v922_v34, %v1027_v32  ;;  %v1089_v5 = vstv %s1373_s12 }
 0x2ac   :  { %744 = vst.msk [vmem:[#allocation6 + $0x28] sm:$0xff] %vm118_vm5, %v728_v28  ;;  %v1090_v56 = vadd.f32 %v1089_v5, %v1031_v54 }
 0x2ad   :  { %1030 = vst.msk [vmem:[#allocation7] sm:$0x1] %vm78_vm6, %v1028_v60 }
 0x2ae   :  { %1091 = vst.msk [vmem:[#allocation8] sm:$0x1] %vm78_vm6, %v1090_v56 }
 0x2b1   :  { %v716_v7 = vpop.xlane.xlu0 %715 }
 0x2b2   :  { %v735_v4 = vadd.f32 %v716_v7, %v559_v43  ;;  %v496_v43 = vld [vmem:[#allocation6 + $0x68] sm:$0xff] }
 0x2b4   :  { %751 = vst.msk [vmem:[#allocation6 + $0x60] sm:$0xff] %vm118_vm5, %v735_v4  ;;  %v1172_v11 = vld [vmem:[#allocation7] sm:$0x1] }
 0x2b5   :  { %v1254_v34 = vld [vmem:[#allocation8] sm:$0x1] }
 0x2bb   :  { %v1221_v27 = vpop.xlane.xlu2 %1220 }
 0x2bc   :  { %v1222_v41 = vrot.slane %v1221_v27, 4 }
 0x2be   :  { %v1223_v21 = vadd.f32 %v1222_v41, %v1221_v27  ;;  %v543_v27 = vmul.f32 1.442695, %v513_v0 }
 0x2c0   :  { %v1224_v20 = vrot.slane %v1223_v21, 2 }
 0x2c2   :  { %v1225_v37 = vadd.f32 %v1224_v20, %v1223_v21  ;;  %v497_v21 = vld [vmem:[#allocation6 + $0x70] sm:$0xff] }
 0x2c3   :  { %v636_v39 = vpop.permute.xlu2 %635 }
 0x2c4   :  { %v657_v38 = vsub.f32 %v2429_v3, %v636_v39  ;;  %v1226_v23 = vrot.slane %v1225_v37, 1 }
 0x2c6   :  { %v687_v12 = vmul.f32 1.442695, %v657_v38  ;;  %v1227_v6 = vadd.f32 %v1226_v23, %v1225_v37 }
 0x2c8   :  { %1450 = vpow2.f32 %v687_v12  ;;  %1374 = vpush %v1227_v6 }
 0x2c9   :  { %1376 = vpush %v1250_v47  ;;  %1452 = vpow2.f32 %v521_v22 }
 0x2ca   :  { %1454 = vpow2.f32 %v545_v10 }
 0x2cb   :  { %1456 = vpow2.f32 %v535_v1 }
 0x2cc   :  { %1458 = vpow2.f32 %v541_v51 }
 0x2cd   :  { %1460 = vpow2.f32 %v543_v27 }
 0x2ce   :  { %v1451_v63 = vpop.eup %1450 }
 0x2cf   :  { %719 = vadd.xlane.f32.xlu1 %v1451_v63  ;;  %v1453_v48 = vpop.eup %1452 }
 0x2d0   :  { %v1455_v42 = vpop.eup %1454  ;;  %v550_v62 = vmul.f32 %v1453_v48, %v486_v49 }
 0x2d1   :  { %v562_v14 = vmul.f32 %v1455_v42, %v498_v26  ;;  %v1457_v59 = vpop.eup %1456 }
 0x2d2   :  { %v557_v54 = vmul.f32 %v1457_v59, %v493_v16  ;;  %v1459_v35 = vpop.eup %1458 }
 0x2d3   :  { %v560_v7 = vmul.f32 %v1459_v35, %v496_v43  ;;  %v1461_v41 = vpop.eup %1460 }
 0x2d4   :  { %v561_v57 = vmul.f32 %v1461_v41, %v497_v21 }
 0x2f9   :  { %s1375_s13 = spop %1374 }
 0x2fa   :  { %v1229_v44 = vstv %s1375_s13  ;;  %s1377_s14 = spop %1376 }
 0x2fb   :  { %v1230_v55 = vadd.f32 %v1229_v44, %v1172_v11  ;;  %v1255_v24 = vstv %s1377_s14 }
 0x2fc   :  { %v698_v40 = vpop.xlane.xlu2 %697  ;;  %v1256_v45 = vsub.f32 %v1255_v24, %v1254_v34 }
 0x2fd   :  { %v722_v17 = vpop.xlane.xlu0 %721  ;;  %1231 = vst.msk [vmem:[#allocation7] sm:$0x1] %vm78_vm6, %v1230_v55  ;;  %v726_v15 = vadd.f32 %v698_v40, %v550_v62 }
 0x2fe   :  { %v738_v58 = vadd.f32 %v722_v17, %v562_v14  ;;  %v1257_v5 = vmul.f32 0.125, %v1256_v45 }
 0x2ff   :  { %742 = vst.msk [vmem:[#allocation6 + $0x18] sm:$0xff] %vm118_vm5, %v726_v15 }
 0x300   :  { %754 = vst.msk [vmem:[#allocation6 + $0x78] sm:$0xff] %vm118_vm5, %v738_v58 }
 0x304   :  { %v1252_v32 = vld [vmem:[#allocation7] sm:$0x1]  ;;  %v712_v28 = vpop.xlane.xlu2 %711 }
 0x305   :  { %v1253_v60 = vmul.f32 0.125, %v1252_v32  ;;  %v733_v56 = vadd.f32 %v712_v28, %v557_v54 }
 0x307   :  { %v1258_v31 = vadd.f32 %v1257_v5, %v1253_v60  ;;  %749 = vst.msk [vmem:[#allocation6 + $0x50] sm:$0xff] %vm118_vm5, %v733_v56 }
 0x309   :  { %v1259_v50 = vmul.f32 0.5, %v1258_v31 }
 0x30b   :  { %1260 = vst.msk [vmem:[#allocation11] sm:$0x1] %vm78_vm6, %v1259_v50 }
 0x30c   :  { %v718_v4 = vpop.xlane.xlu2 %717  ;;  %1271 = dma.vmem_to_hbm [thread:$0]  %s1267_s15, 16, %s1269_s18, [#allocation12]  }
 0x30d   :  { %v736_v9 = vadd.f32 %v718_v4, %v560_v7 }
 0x30f   :  { %752 = vst.msk [vmem:[#allocation6 + $0x68] sm:$0xff] %vm118_vm5, %v736_v9 }
 0x342   :  { %v720_v20 = vpop.xlane.xlu1 %719 }
 0x343   :  { %v737_v37 = vadd.f32 %v720_v20, %v561_v57 }
 0x345   :  { %753 = vst.msk [vmem:[#allocation6 + $0x70] sm:$0xff] %vm118_vm5, %v737_v37 }
 0x346   :  { %1488 = dma.done.wait [#allocation12], 16  }
 0x347   :  { %1489 = vsyncadd [#allocation12], 4294967280 }
 0x348   :  { %1276 = vsyncpa [#allocation12], 1 }
 0x349   :  { %1277 = vsyncmov [#allocation9] }
 0x34c   :  { %s1278_s5 = vpop.sfrf %1277 }
 0x34d   :  { %p1319_p0 = scmp.ne.s32.totalorder %s1278_s5, 0 }
 0x34f   :  { %1282 = shalt.err (%p1319_p0)  }

</bundles_post_ra>
